<compile_context>
chip_gen: v7x
topology: tpu7x:2x2x1
jax: 0.10.0
libtpu: 0.0.40
codegen_flags: <defaults>
</compile_context>

<pallas_src>
import functools

import jax
import jax.numpy as jnp
from jax.experimental import pallas as pl
from jax.experimental.pallas import tpu as pltpu


def _bigru_rec_kernel(gi_f_ref, gi_b_ref, whh_f_ref, whh_b_ref,
                      b_f_ref, b_b_ref, bhn_f_ref, bhn_b_ref,
                      out_f_ref, out_b_ref, hf_scr, hb_scr,
                      *, hidden_size, block_t, pad_steps):
    """Recurrent part only.

    gi_f_ref: (TT, Bp, 3H) fwd input gates, natural time (block tb).
    gi_b_ref: (TT, Bp, 3H) bwd input gates, natural time (block NB-1-tb).
    whh_*_ref: (H, 3H) recurrent weights (compute dtype, e.g. bf16).
    b_*_ref:   (1, 3H) f32, bih + bhh_{r,z} folded (n part zero).
    bhn_*_ref: (1, H) f32, n-gate hidden bias.
    out_*_ref: (TT, Bp, H) per-direction outputs, both in natural time.
    h*_scr:    (Bp, H) f32 carries.
    """
    H = hidden_size
    TT = block_t
    tb = pl.program_id(0)

    @pl.when(tb == 0)
    def _init():
        hf_scr[...] = jnp.zeros_like(hf_scr)
        hb_scr[...] = jnp.zeros_like(hb_scr)

    whh_f = whh_f_ref[...]            # (H, 3H), block-resident
    whh_b = whh_b_ref[...]
    b_f = b_f_ref[...]                # (1, 3H) f32
    b_b = b_b_ref[...]
    bhn_f = bhn_f_ref[...]            # (1, H) f32
    bhn_b = bhn_b_ref[...]
    mm_dtype = whh_f.dtype

    def cell(gi, gh, h, bn):
        # PyTorch GRU cell; gi already contains bih + bhh_{r,z} (added in f32).
        r = jax.nn.sigmoid(gi[:, :H] + gh[:, :H])
        z = jax.nn.sigmoid(gi[:, H:2 * H] + gh[:, H:2 * H])
        n = jnp.tanh(gi[:, 2 * H:] + r * (gh[:, 2 * H:] + bn))
        return (1.0 - z) * n + z * h

    def step(s, carry):
        hf, hb = carry

        # ---- forward direction: natural time within the block ----
        gi_f = gi_f_ref[s].astype(jnp.float32) + b_f
        gh_f = jnp.dot(hf.astype(mm_dtype), whh_f,
                       preferred_element_type=jnp.float32)
        hf_new = cell(gi_f, gh_f, hf, bhn_f)
        out_f_ref[s] = hf_new.astype(out_f_ref.dtype)

        # ---- backward direction: reversed time inside the reversed block ----
        gi_b = gi_b_ref[TT - 1 - s].astype(jnp.float32) + b_b
        gh_b = jnp.dot(hb.astype(mm_dtype), whh_b,
                       preferred_element_type=jnp.float32)
        hb_new = cell(gi_b, gh_b, hb, bhn_b)
        out_b_ref[TT - 1 - s] = hb_new.astype(out_b_ref.dtype)

        if pad_steps:
            # The bwd recurrence visits the zero-padded tail first; keep the
            # carry at h0 through those steps (their outputs are sliced off).
            valid = (tb * TT + s) >= pad_steps
            hb_new = jnp.where(valid, hb_new, hb)
        # Note: fwd hits padding only AFTER all valid steps, so its outputs are
        # unaffected; h_n is not returned by this module so no gating needed.
        return hf_new, hb_new

    hf, hb = jax.lax.fori_loop(0, TT, step, (hf_scr[...], hb_scr[...]),
                               unroll=True)
    hf_scr[...] = hf
    hb_scr[...] = hb


def bigru_forward(x, params, *, block_t=16, compute_dtype=jnp.bfloat16):
    """x: (B, T, I) float32 -> (B, T, 2H) (PyTorch bidirectional nn.GRU output)."""
    B, T, I = x.shape
    H = params["whh_f"].shape[1]          # whh has shape (3H, H)
    f32 = jnp.float32
    cdt = compute_dtype

    TT = max(1, min(block_t, T))
    NB = pl.cdiv(T, TT)
    T_pad = NB * TT
    Bp = ((B + 7) // 8) * 8               # pad batch to f32 sublane / MXU M dim

    xt = jnp.transpose(x, (1, 0, 2)).astype(cdt)          # (T, B, I), time-major
    if (T_pad, Bp) != (T, B):
        xt = jnp.pad(xt, ((0, T_pad - T), (0, Bp - B), (0, 0)))

    # --- Hoisted input projections: two natural-time matmuls, no reverse/concat.
    gi_f = jnp.einsum('tbi,ig->tbg', xt, params["wih_f"].T.astype(cdt),
                      preferred_element_type=f32).astype(cdt)   # (T_pad, Bp, 3H)
    gi_b = jnp.einsum('tbi,ig->tbg', xt, params["wih_b"].T.astype(cdt),
                      preferred_element_type=f32).astype(cdt)

    whh_f_t = params["whh_f"].T.astype(cdt)               # (H, 3H)
    whh_b_t = params["whh_b"].T.astype(cdt)

    # Biases stay f32 and are added inside the kernel after GI is upcast, so
    # bf16 GI storage does not lose bias precision.  bih and the r/z parts of
    # bhh fold together; the n-gate hidden bias stays separate.
    zH = jnp.zeros((H,), f32)
    b_f = (params["bih_f"] + jnp.concatenate([params["bhh_f"][:2 * H], zH])
           ).reshape(1, 3 * H).astype(f32)
    b_b = (params["bih_b"] + jnp.concatenate([params["bhh_b"][:2 * H], zH])
           ).reshape(1, 3 * H).astype(f32)
    bhn_f = params["bhh_f"][2 * H:].reshape(1, H).astype(f32)
    bhn_b = params["bhh_b"][2 * H:].reshape(1, H).astype(f32)

    kernel = functools.partial(_bigru_rec_kernel, hidden_size=H, block_t=TT,
                               pad_steps=T_pad - T)

    out_f, out_b = pl.pallas_call(
        kernel,
        grid=(NB,),
        in_specs=[
            pl.BlockSpec((TT, Bp, 3 * H), lambda tb: (tb, 0, 0)),              # GI fwd
            pl.BlockSpec((TT, Bp, 3 * H), lambda tb, nb=NB: (nb - 1 - tb, 0, 0)),  # GI bwd (reversed blocks)
            pl.BlockSpec((H, 3 * H), lambda tb: (0, 0)),                       # Whh fwd
            pl.BlockSpec((H, 3 * H), lambda tb: (0, 0)),                       # Whh bwd
            pl.BlockSpec((1, 3 * H), lambda tb: (0, 0)),                       # bias fwd
            pl.BlockSpec((1, 3 * H), lambda tb: (0, 0)),                       # bias bwd
            pl.BlockSpec((1, H), lambda tb: (0, 0)),                           # bhh_n fwd
            pl.BlockSpec((1, H), lambda tb: (0, 0)),                           # bhh_n bwd
        ],
        out_specs=[
            pl.BlockSpec((TT, Bp, H), lambda tb: (tb, 0, 0)),                  # fwd out, natural time
            pl.BlockSpec((TT, Bp, H), lambda tb, nb=NB: (nb - 1 - tb, 0, 0)),  # bwd out, natural time
        ],
        out_shape=[
            jax.ShapeDtypeStruct((T_pad, Bp, H), x.dtype),
            jax.ShapeDtypeStruct((T_pad, Bp, H), x.dtype),
        ],
        scratch_shapes=[pltpu.VMEM((Bp, H), jnp.float32),
                        pltpu.VMEM((Bp, H), jnp.float32)],
        compiler_params=pltpu.CompilerParams(
            dimension_semantics=("arbitrary",),           # recurrence: sequential
            vmem_limit_bytes=48 * 1024 * 1024),           # safe under v7x's 64 MiB
    )(gi_f, gi_b, whh_f_t, whh_b_t, b_f, b_b, bhn_f, bhn_b)

    # Epilogue: drop time/batch padding, fuse [fwd|bwd] and go batch-major.
    out = jnp.concatenate([out_f[:T, :B], out_b[:T, :B]], axis=-1)  # (T, B, 2H)
    return jnp.transpose(out, (1, 0, 2)).astype(x.dtype)            # (B, T, 2H)


# ----------------------------- pure-JAX reference -----------------------------

def _ref_gru_dir(x, wih, whh, bih, bhh):
    """Pure-JAX reference for one direction. x:(B,T,I), weights in PyTorch layout."""
    B, T, I = x.shape
    H = whh.shape[1]
    wih_t, whh_t = wih.T, whh.T

    def step(h, xt):
        gi = xt @ wih_t + bih
        gh = h @ whh_t + bhh
        r = jax.nn.sigmoid(gi[:, :H] + gh[:, :H])
        z = jax.nn.sigmoid(gi[:, H:2 * H] + gh[:, H:2 * H])
        n = jnp.tanh(gi[:, 2 * H:] + r * gh[:, 2 * H:])
        h_new = (1.0 - z) * n + z * h
        return h_new, h_new

    h0 = jnp.zeros((B, H), x.dtype)
    _, ys = jax.lax.scan(step, h0, jnp.transpose(x, (1, 0, 2)))
    return jnp.transpose(ys, (1, 0, 2))


def _ref_bigru(x, params):
    out_f = _ref_gru_dir(x, params["wih_f"], params["whh_f"],
                         params["bih_f"], params["bhh_f"])
    out_b = _ref_gru_dir(x[:, ::-1, :], params["wih_b"], params["whh_b"],
                         params["bih_b"], params["bhh_b"])[:, ::-1, :]
    return jnp.concatenate([out_f, out_b], axis=-1)


def init_params(key, input_size, hidden_size):
    """PyTorch nn.GRU default init: U(-1/sqrt(H), 1/sqrt(H)) for all params."""
    k = 1.0 / jnp.sqrt(jnp.float32(hidden_size))
    names_shapes = [
        ("wih_f", (3 * hidden_size, input_size)),
        ("whh_f", (3 * hidden_size, hidden_size)),
        ("bih_f", (3 * hidden_size,)),
        ("bhh_f", (3 * hidden_size,)),
        ("wih_b", (3 * hidden_size, input_size)),
        ("whh_b", (3 * hidden_size, hidden_size)),
        ("bih_b", (3 * hidden_size,)),
        ("bhh_b", (3 * hidden_size,)),
    ]
    keys = jax.random.split(key, len(names_shapes))
    return {name: jax.random.uniform(kk, shape, jnp.float32, -k, k)
            for kk, (name, shape) in zip(keys, names_shapes)}


if __name__ == "__main__":
    B, T, I, H = 2, 8, 16, 32
    key = jax.random.PRNGKey(0)
    kx, kp = jax.random.split(key)
    x = jax.random.normal(kx, (B, T, I), jnp.float32)
    params = init_params(kp, I, H)
    ref = jax.block_until_ready(_ref_bigru(x, params))

    # Exact path (f32 everywhere), block_t=4 -> 2 sequential grid steps:
    # exercises the cross-block hidden carry and the index-map time reversal.
    out = jax.block_until_ready(
        bigru_forward(x, params, block_t=4, compute_dtype=jnp.float32))
    assert out.shape == (B, T, 2 * H), out.shape
    assert jnp.allclose(out, ref, atol=1e-5, rtol=1e-5), \
        float(jnp.max(jnp.abs(out - ref)))

    # T not divisible by block_t: exercises padding + bwd carry gating.
    x2 = x[:, :6]
    ref2 = jax.block_until_ready(_ref_bigru(x2, params))
    out2 = jax.block_until_ready(
        bigru_forward(x2, params, block_t=4, compute_dtype=jnp.float32))
    assert out2.shape == (B, 6, 2 * H), out2.shape
    assert jnp.allclose(out2, ref2, atol=1e-5, rtol=1e-5), \
        float(jnp.max(jnp.abs(out2 - ref2)))

    # Default fast path (bf16 GI / weights, f32 carry + cell math).
    out3 = jax.block_until_ready(bigru_forward(x, params, block_t=4))
    err = float(jnp.max(jnp.abs(out3 - ref)))
    assert out3.shape == (B, T, 2 * H), out3.shape
    assert err < 1e-1, err

    print("KERNEL_OK")
</pallas_src>

<mosaic_0001>
module attributes {stable_mosaic.version = 11 : i64} {
  func.func @_bigru_rec_kernel(%arg0: i32, %arg1: memref<4x8x96xf32, #tpu.memory_space<vmem>>, %arg2: memref<4x8x96xf32, #tpu.memory_space<vmem>>, %arg3: memref<32x96xf32, #tpu.memory_space<vmem>>, %arg4: memref<32x96xf32, #tpu.memory_space<vmem>>, %arg5: memref<1x96xf32, #tpu.memory_space<vmem>>, %arg6: memref<1x96xf32, #tpu.memory_space<vmem>>, %arg7: memref<1x32xf32, #tpu.memory_space<vmem>>, %arg8: memref<1x32xf32, #tpu.memory_space<vmem>>, %arg9: memref<4x8x32xf32, #tpu.memory_space<vmem>>, %arg10: memref<4x8x32xf32, #tpu.memory_space<vmem>>, %arg11: memref<8x32xf32, #tpu.memory_space<vmem>>, %arg12: memref<8x32xf32, #tpu.memory_space<vmem>>) attributes {dimension_semantics = [#tpu.dimension_semantics<arbitrary>], iteration_bounds = array<i64: 2>, scalar_prefetch = 0 : i64, scratch_operands = 2 : i64, tpu.core_type = #tpu.core_type<tc>, window_params = [{transform_indices = @transform_0, window_bounds = array<i64: 4, 8, 96>}, {transform_indices = @transform_1, window_bounds = array<i64: 4, 8, 96>}, {pipeline_mode = #tpu.pipeline_mode<synchronous>, transform_indices = @transform_2, window_bounds = array<i64: 32, 96>}, {pipeline_mode = #tpu.pipeline_mode<synchronous>, transform_indices = @transform_3, window_bounds = array<i64: 32, 96>}, {pipeline_mode = #tpu.pipeline_mode<synchronous>, transform_indices = @transform_4, window_bounds = array<i64: 1, 96>}, {pipeline_mode = #tpu.pipeline_mode<synchronous>, transform_indices = @transform_5, window_bounds = array<i64: 1, 96>}, {pipeline_mode = #tpu.pipeline_mode<synchronous>, transform_indices = @transform_6, window_bounds = array<i64: 1, 32>}, {pipeline_mode = #tpu.pipeline_mode<synchronous>, transform_indices = @transform_7, window_bounds = array<i64: 1, 32>}, {transform_indices = @transform_8, window_bounds = array<i64: 4, 8, 32>}, {transform_indices = @transform_9, window_bounds = array<i64: 4, 8, 32>}]} {
    %c0_i32 = arith.constant 0 : i32
    %0 = arith.cmpi eq, %arg0, %c0_i32 : i32
    %1 = arith.extui %0 : i1 to i32
    %c0_i32_0 = arith.constant 0 : i32
    %2 = arith.cmpi ne, %1, %c0_i32_0 : i32
    scf.if %2 {
      %cst_92 = arith.constant 0.000000e+00 : f32
      %325 = vector.broadcast %cst_92 : f32 to vector<8x32xf32>
      %c0_93 = arith.constant 0 : index
      %c0_94 = arith.constant 0 : index
      %326 = vector.load %arg11[%c0_93, %c0_94] : memref<8x32xf32, #tpu.memory_space<vmem>>, vector<8x32xf32>
      tpu.vector_store %arg11[%c0_93, %c0_94], %325 {strides = array<i32>} : memref<8x32xf32, #tpu.memory_space<vmem>>, vector<8x32xf32>,
      %cst_95 = arith.constant 0.000000e+00 : f32
      %327 = vector.broadcast %cst_95 : f32 to vector<8x32xf32>
      %c0_96 = arith.constant 0 : index
      %c0_97 = arith.constant 0 : index
      %328 = vector.load %arg12[%c0_96, %c0_97] : memref<8x32xf32, #tpu.memory_space<vmem>>, vector<8x32xf32>
      tpu.vector_store %arg12[%c0_96, %c0_97], %327 {strides = array<i32>} : memref<8x32xf32, #tpu.memory_space<vmem>>, vector<8x32xf32>,
    } else {
    }
    %c0 = arith.constant 0 : index
    %c0_1 = arith.constant 0 : index
    %3 = vector.load %arg3[%c0, %c0_1] : memref<32x96xf32, #tpu.memory_space<vmem>>, vector<32x96xf32>
    %c0_2 = arith.constant 0 : index
    %c0_3 = arith.constant 0 : index
    %4 = vector.load %arg4[%c0_2, %c0_3] : memref<32x96xf32, #tpu.memory_space<vmem>>, vector<32x96xf32>
    %c0_4 = arith.constant 0 : index
    %c0_5 = arith.constant 0 : index
    %5 = vector.load %arg5[%c0_4, %c0_5] : memref<1x96xf32, #tpu.memory_space<vmem>>, vector<1x96xf32>
    %c0_6 = arith.constant 0 : index
    %c0_7 = arith.constant 0 : index
    %6 = vector.load %arg6[%c0_6, %c0_7] : memref<1x96xf32, #tpu.memory_space<vmem>>, vector<1x96xf32>
    %c0_8 = arith.constant 0 : index
    %c0_9 = arith.constant 0 : index
    %7 = vector.load %arg7[%c0_8, %c0_9] : memref<1x32xf32, #tpu.memory_space<vmem>>, vector<1x32xf32>
    %c0_10 = arith.constant 0 : index
    %c0_11 = arith.constant 0 : index
    %8 = vector.load %arg8[%c0_10, %c0_11] : memref<1x32xf32, #tpu.memory_space<vmem>>, vector<1x32xf32>
    %c0_12 = arith.constant 0 : index
    %c0_13 = arith.constant 0 : index
    %9 = vector.load %arg11[%c0_12, %c0_13] : memref<8x32xf32, #tpu.memory_space<vmem>>, vector<8x32xf32>
    %c0_14 = arith.constant 0 : index
    %c0_15 = arith.constant 0 : index
    %10 = vector.load %arg12[%c0_14, %c0_15] : memref<8x32xf32, #tpu.memory_space<vmem>>, vector<8x32xf32>
    %c0_i32_16 = arith.constant 0 : i32
    %11 = arith.index_cast %c0_i32_16 : i32 to index
    %c0_17 = arith.constant 0 : index
    %c0_18 = arith.constant 0 : index
    %12 = vector.load %arg1[%11, %c0_17, %c0_18] : memref<4x8x96xf32, #tpu.memory_space<vmem>>, vector<1x8x96xf32>
    %13 = vector.shape_cast %12 : vector<1x8x96xf32> to vector<8x96xf32>
    %14 = vector.broadcast %5 : vector<1x96xf32> to vector<8x96xf32>
    %15 = arith.addf %13, %14 : vector<8x96xf32>
    %cst = arith.constant dense<0.000000e+00> : vector<8x96xf32>
    %16 = tpu.matmul %9, %3, %cst {dimension_numbers = #tpu.dot_dimension_numbers<[1], [0], [0], [1], [0, 0, 1, 1], [], []>} : vector<8x32xf32>, vector<32x96xf32>, vector<8x96xf32> -> vector<8x96xf32>
    %17 = vector.extract_strided_slice %15 {offsets = [0, 0], sizes = [8, 32], strides = [1, 1]} : vector<8x96xf32> to vector<8x32xf32>
    %18 = vector.extract_strided_slice %16 {offsets = [0, 0], sizes = [8, 32], strides = [1, 1]} : vector<8x96xf32> to vector<8x32xf32>
    %19 = arith.addf %17, %18 : vector<8x32xf32>
    %20 = arith.negf %19 : vector<8x32xf32>
    %21 = math.exp %20 : vector<8x32xf32>
    %cst_19 = arith.constant 1.000000e+00 : f32
    %22 = vector.broadcast %cst_19 : f32 to vector<8x32xf32>
    %23 = arith.addf %22, %21 : vector<8x32xf32>
    %24 = arith.divf %22, %23 : vector<8x32xf32>
    %25 = vector.extract_strided_slice %15 {offsets = [0, 32], sizes = [8, 32], strides = [1, 1]} : vector<8x96xf32> to vector<8x32xf32>
    %26 = vector.extract_strided_slice %16 {offsets = [0, 32], sizes = [8, 32], strides = [1, 1]} : vector<8x96xf32> to vector<8x32xf32>
    %27 = arith.addf %25, %26 : vector<8x32xf32>
    %28 = arith.negf %27 : vector<8x32xf32>
    %29 = math.exp %28 : vector<8x32xf32>
    %cst_20 = arith.constant 1.000000e+00 : f32
    %30 = vector.broadcast %cst_20 : f32 to vector<8x32xf32>
    %31 = arith.addf %30, %29 : vector<8x32xf32>
    %32 = arith.divf %30, %31 : vector<8x32xf32>
    %33 = vector.extract_strided_slice %15 {offsets = [0, 64], sizes = [8, 32], strides = [1, 1]} : vector<8x96xf32> to vector<8x32xf32>
    %34 = vector.extract_strided_slice %16 {offsets = [0, 64], sizes = [8, 32], strides = [1, 1]} : vector<8x96xf32> to vector<8x32xf32>
    %35 = vector.broadcast %7 : vector<1x32xf32> to vector<8x32xf32>
    %36 = arith.addf %34, %35 : vector<8x32xf32>
    %37 = arith.mulf %24, %36 : vector<8x32xf32>
    %38 = arith.addf %33, %37 : vector<8x32xf32>
    %39 = math.tanh %38 : vector<8x32xf32>
    %cst_21 = arith.constant 1.000000e+00 : f32
    %40 = vector.broadcast %cst_21 : f32 to vector<8x32xf32>
    %41 = arith.subf %40, %32 : vector<8x32xf32>
    %42 = arith.mulf %41, %39 : vector<8x32xf32>
    %43 = arith.mulf %32, %9 : vector<8x32xf32>
    %44 = arith.addf %42, %43 : vector<8x32xf32>
    %45 = arith.index_cast %c0_i32_16 : i32 to index
    %c0_22 = arith.constant 0 : index
    %c0_23 = arith.constant 0 : index
    %46 = vector.load %arg9[%45, %c0_22, %c0_23] : memref<4x8x32xf32, #tpu.memory_space<vmem>>, vector<1x8x32xf32>
    %47 = vector.shape_cast %46 : vector<1x8x32xf32> to vector<8x32xf32>
    %48 = vector.shape_cast %44 : vector<8x32xf32> to vector<1x8x32xf32>
    tpu.vector_store %arg9[%45, %c0_22, %c0_23], %48 {strides = array<i32>} : memref<4x8x32xf32, #tpu.memory_space<vmem>>, vector<1x8x32xf32>,
    %c3_i32 = arith.constant 3 : i32
    %49 = arith.subi %c3_i32, %c0_i32_16 : i32
    %50 = arith.index_cast %49 : i32 to index
    %c0_24 = arith.constant 0 : index
    %c0_25 = arith.constant 0 : index
    %51 = vector.load %arg2[%50, %c0_24, %c0_25] : memref<4x8x96xf32, #tpu.memory_space<vmem>>, vector<1x8x96xf32>
    %52 = vector.shape_cast %51 : vector<1x8x96xf32> to vector<8x96xf32>
    %53 = vector.broadcast %6 : vector<1x96xf32> to vector<8x96xf32>
    %54 = arith.addf %52, %53 : vector<8x96xf32>
    %cst_26 = arith.constant dense<0.000000e+00> : vector<8x96xf32>
    %55 = tpu.matmul %10, %4, %cst_26 {dimension_numbers = #tpu.dot_dimension_numbers<[1], [0], [0], [1], [0, 0, 1, 1], [], []>} : vector<8x32xf32>, vector<32x96xf32>, vector<8x96xf32> -> vector<8x96xf32>
    %56 = vector.extract_strided_slice %54 {offsets = [0, 0], sizes = [8, 32], strides = [1, 1]} : vector<8x96xf32> to vector<8x32xf32>
    %57 = vector.extract_strided_slice %55 {offsets = [0, 0], sizes = [8, 32], strides = [1, 1]} : vector<8x96xf32> to vector<8x32xf32>
    %58 = arith.addf %56, %57 : vector<8x32xf32>
    %59 = arith.negf %58 : vector<8x32xf32>
    %60 = math.exp %59 : vector<8x32xf32>
    %cst_27 = arith.constant 1.000000e+00 : f32
    %61 = vector.broadcast %cst_27 : f32 to vector<8x32xf32>
    %62 = arith.addf %61, %60 : vector<8x32xf32>
    %63 = arith.divf %61, %62 : vector<8x32xf32>
    %64 = vector.extract_strided_slice %54 {offsets = [0, 32], sizes = [8, 32], strides = [1, 1]} : vector<8x96xf32> to vector<8x32xf32>
    %65 = vector.extract_strided_slice %55 {offsets = [0, 32], sizes = [8, 32], strides = [1, 1]} : vector<8x96xf32> to vector<8x32xf32>
    %66 = arith.addf %64, %65 : vector<8x32xf32>
    %67 = arith.negf %66 : vector<8x32xf32>
    %68 = math.exp %67 : vector<8x32xf32>
    %cst_28 = arith.constant 1.000000e+00 : f32
    %69 = vector.broadcast %cst_28 : f32 to vector<8x32xf32>
    %70 = arith.addf %69, %68 : vector<8x32xf32>
    %71 = arith.divf %69, %70 : vector<8x32xf32>
    %72 = vector.extract_strided_slice %54 {offsets = [0, 64], sizes = [8, 32], strides = [1, 1]} : vector<8x96xf32> to vector<8x32xf32>
    %73 = vector.extract_strided_slice %55 {offsets = [0, 64], sizes = [8, 32], strides = [1, 1]} : vector<8x96xf32> to vector<8x32xf32>
    %74 = vector.broadcast %8 : vector<1x32xf32> to vector<8x32xf32>
    %75 = arith.addf %73, %74 : vector<8x32xf32>
    %76 = arith.mulf %63, %75 : vector<8x32xf32>
    %77 = arith.addf %72, %76 : vector<8x32xf32>
    %78 = math.tanh %77 : vector<8x32xf32>
    %cst_29 = arith.constant 1.000000e+00 : f32
    %79 = vector.broadcast %cst_29 : f32 to vector<8x32xf32>
    %80 = arith.subf %79, %71 : vector<8x32xf32>
    %81 = arith.mulf %80, %78 : vector<8x32xf32>
    %82 = arith.mulf %71, %10 : vector<8x32xf32>
    %83 = arith.addf %81, %82 : vector<8x32xf32>
    %c3_i32_30 = arith.constant 3 : i32
    %84 = arith.subi %c3_i32_30, %c0_i32_16 : i32
    %85 = arith.index_cast %84 : i32 to index
    %c0_31 = arith.constant 0 : index
    %c0_32 = arith.constant 0 : index
    %86 = vector.load %arg10[%85, %c0_31, %c0_32] : memref<4x8x32xf32, #tpu.memory_space<vmem>>, vector<1x8x32xf32>
    %87 = vector.shape_cast %86 : vector<1x8x32xf32> to vector<8x32xf32>
    %88 = vector.shape_cast %83 : vector<8x32xf32> to vector<1x8x32xf32>
    tpu.vector_store %arg10[%85, %c0_31, %c0_32], %88 {strides = array<i32>} : memref<4x8x32xf32, #tpu.memory_space<vmem>>, vector<1x8x32xf32>,
    %c1_i32 = arith.constant 1 : i32
    %89 = arith.index_cast %c1_i32 : i32 to index
    %c0_33 = arith.constant 0 : index
    %c0_34 = arith.constant 0 : index
    %90 = vector.load %arg1[%89, %c0_33, %c0_34] : memref<4x8x96xf32, #tpu.memory_space<vmem>>, vector<1x8x96xf32>
    %91 = vector.shape_cast %90 : vector<1x8x96xf32> to vector<8x96xf32>
    %92 = vector.broadcast %5 : vector<1x96xf32> to vector<8x96xf32>
    %93 = arith.addf %91, %92 : vector<8x96xf32>
    %cst_35 = arith.constant dense<0.000000e+00> : vector<8x96xf32>
    %94 = tpu.matmul %44, %3, %cst_35 {dimension_numbers = #tpu.dot_dimension_numbers<[1], [0], [0], [1], [0, 0, 1, 1], [], []>} : vector<8x32xf32>, vector<32x96xf32>, vector<8x96xf32> -> vector<8x96xf32>
    %95 = vector.extract_strided_slice %93 {offsets = [0, 0], sizes = [8, 32], strides = [1, 1]} : vector<8x96xf32> to vector<8x32xf32>
    %96 = vector.extract_strided_slice %94 {offsets = [0, 0], sizes = [8, 32], strides = [1, 1]} : vector<8x96xf32> to vector<8x32xf32>
    %97 = arith.addf %95, %96 : vector<8x32xf32>
    %98 = arith.negf %97 : vector<8x32xf32>
    %99 = math.exp %98 : vector<8x32xf32>
    %cst_36 = arith.constant 1.000000e+00 : f32
    %100 = vector.broadcast %cst_36 : f32 to vector<8x32xf32>
    %101 = arith.addf %100, %99 : vector<8x32xf32>
    %102 = arith.divf %100, %101 : vector<8x32xf32>
    %103 = vector.extract_strided_slice %93 {offsets = [0, 32], sizes = [8, 32], strides = [1, 1]} : vector<8x96xf32> to vector<8x32xf32>
    %104 = vector.extract_strided_slice %94 {offsets = [0, 32], sizes = [8, 32], strides = [1, 1]} : vector<8x96xf32> to vector<8x32xf32>
    %105 = arith.addf %103, %104 : vector<8x32xf32>
    %106 = arith.negf %105 : vector<8x32xf32>
    %107 = math.exp %106 : vector<8x32xf32>
    %cst_37 = arith.constant 1.000000e+00 : f32
    %108 = vector.broadcast %cst_37 : f32 to vector<8x32xf32>
    %109 = arith.addf %108, %107 : vector<8x32xf32>
    %110 = arith.divf %108, %109 : vector<8x32xf32>
    %111 = vector.extract_strided_slice %93 {offsets = [0, 64], sizes = [8, 32], strides = [1, 1]} : vector<8x96xf32> to vector<8x32xf32>
    %112 = vector.extract_strided_slice %94 {offsets = [0, 64], sizes = [8, 32], strides = [1, 1]} : vector<8x96xf32> to vector<8x32xf32>
    %113 = vector.broadcast %7 : vector<1x32xf32> to vector<8x32xf32>
    %114 = arith.addf %112, %113 : vector<8x32xf32>
    %115 = arith.mulf %102, %114 : vector<8x32xf32>
    %116 = arith.addf %111, %115 : vector<8x32xf32>
    %117 = math.tanh %116 : vector<8x32xf32>
    %cst_38 = arith.constant 1.000000e+00 : f32
    %118 = vector.broadcast %cst_38 : f32 to vector<8x32xf32>
    %119 = arith.subf %118, %110 : vector<8x32xf32>
    %120 = arith.mulf %119, %117 : vector<8x32xf32>
    %121 = arith.mulf %110, %44 : vector<8x32xf32>
    %122 = arith.addf %120, %121 : vector<8x32xf32>
    %123 = arith.index_cast %c1_i32 : i32 to index
    %c0_39 = arith.constant 0 : index
    %c0_40 = arith.constant 0 : index
    %124 = vector.load %arg9[%123, %c0_39, %c0_40] : memref<4x8x32xf32, #tpu.memory_space<vmem>>, vector<1x8x32xf32>
    %125 = vector.shape_cast %124 : vector<1x8x32xf32> to vector<8x32xf32>
    %126 = vector.shape_cast %122 : vector<8x32xf32> to vector<1x8x32xf32>
    tpu.vector_store %arg9[%123, %c0_39, %c0_40], %126 {strides = array<i32>} : memref<4x8x32xf32, #tpu.memory_space<vmem>>, vector<1x8x32xf32>,
    %c3_i32_41 = arith.constant 3 : i32
    %127 = arith.subi %c3_i32_41, %c1_i32 : i32
    %128 = arith.index_cast %127 : i32 to index
    %c0_42 = arith.constant 0 : index
    %c0_43 = arith.constant 0 : index
    %129 = vector.load %arg2[%128, %c0_42, %c0_43] : memref<4x8x96xf32, #tpu.memory_space<vmem>>, vector<1x8x96xf32>
    %130 = vector.shape_cast %129 : vector<1x8x96xf32> to vector<8x96xf32>
    %131 = vector.broadcast %6 : vector<1x96xf32> to vector<8x96xf32>
    %132 = arith.addf %130, %131 : vector<8x96xf32>
    %cst_44 = arith.constant dense<0.000000e+00> : vector<8x96xf32>
    %133 = tpu.matmul %83, %4, %cst_44 {dimension_numbers = #tpu.dot_dimension_numbers<[1], [0], [0], [1], [0, 0, 1, 1], [], []>} : vector<8x32xf32>, vector<32x96xf32>, vector<8x96xf32> -> vector<8x96xf32>
    %134 = vector.extract_strided_slice %132 {offsets = [0, 0], sizes = [8, 32], strides = [1, 1]} : vector<8x96xf32> to vector<8x32xf32>
    %135 = vector.extract_strided_slice %133 {offsets = [0, 0], sizes = [8, 32], strides = [1, 1]} : vector<8x96xf32> to vector<8x32xf32>
    %136 = arith.addf %134, %135 : vector<8x32xf32>
    %137 = arith.negf %136 : vector<8x32xf32>
    %138 = math.exp %137 : vector<8x32xf32>
    %cst_45 = arith.constant 1.000000e+00 : f32
    %139 = vector.broadcast %cst_45 : f32 to vector<8x32xf32>
    %140 = arith.addf %139, %138 : vector<8x32xf32>
    %141 = arith.divf %139, %140 : vector<8x32xf32>
    %142 = vector.extract_strided_slice %132 {offsets = [0, 32], sizes = [8, 32], strides = [1, 1]} : vector<8x96xf32> to vector<8x32xf32>
    %143 = vector.extract_strided_slice %133 {offsets = [0, 32], sizes = [8, 32], strides = [1, 1]} : vector<8x96xf32> to vector<8x32xf32>
    %144 = arith.addf %142, %143 : vector<8x32xf32>
    %145 = arith.negf %144 : vector<8x32xf32>
    %146 = math.exp %145 : vector<8x32xf32>
    %cst_46 = arith.constant 1.000000e+00 : f32
    %147 = vector.broadcast %cst_46 : f32 to vector<8x32xf32>
    %148 = arith.addf %147, %146 : vector<8x32xf32>
    %149 = arith.divf %147, %148 : vector<8x32xf32>
    %150 = vector.extract_strided_slice %132 {offsets = [0, 64], sizes = [8, 32], strides = [1, 1]} : vector<8x96xf32> to vector<8x32xf32>
    %151 = vector.extract_strided_slice %133 {offsets = [0, 64], sizes = [8, 32], strides = [1, 1]} : vector<8x96xf32> to vector<8x32xf32>
    %152 = vector.broadcast %8 : vector<1x32xf32> to vector<8x32xf32>
    %153 = arith.addf %151, %152 : vector<8x32xf32>
    %154 = arith.mulf %141, %153 : vector<8x32xf32>
    %155 = arith.addf %150, %154 : vector<8x32xf32>
    %156 = math.tanh %155 : vector<8x32xf32>
    %cst_47 = arith.constant 1.000000e+00 : f32
    %157 = vector.broadcast %cst_47 : f32 to vector<8x32xf32>
    %158 = arith.subf %157, %149 : vector<8x32xf32>
    %159 = arith.mulf %158, %156 : vector<8x32xf32>
    %160 = arith.mulf %149, %83 : vector<8x32xf32>
    %161 = arith.addf %159, %160 : vector<8x32xf32>
    %c3_i32_48 = arith.constant 3 : i32
    %162 = arith.subi %c3_i32_48, %c1_i32 : i32
    %163 = arith.index_cast %162 : i32 to index
    %c0_49 = arith.constant 0 : index
    %c0_50 = arith.constant 0 : index
    %164 = vector.load %arg10[%163, %c0_49, %c0_50] : memref<4x8x32xf32, #tpu.memory_space<vmem>>, vector<1x8x32xf32>
    %165 = vector.shape_cast %164 : vector<1x8x32xf32> to vector<8x32xf32>
    %166 = vector.shape_cast %161 : vector<8x32xf32> to vector<1x8x32xf32>
    tpu.vector_store %arg10[%163, %c0_49, %c0_50], %166 {strides = array<i32>} : memref<4x8x32xf32, #tpu.memory_space<vmem>>, vector<1x8x32xf32>,
    %c2_i32 = arith.constant 2 : i32
    %167 = arith.index_cast %c2_i32 : i32 to index
    %c0_51 = arith.constant 0 : index
    %c0_52 = arith.constant 0 : index
    %168 = vector.load %arg1[%167, %c0_51, %c0_52] : memref<4x8x96xf32, #tpu.memory_space<vmem>>, vector<1x8x96xf32>
    %169 = vector.shape_cast %168 : vector<1x8x96xf32> to vector<8x96xf32>
    %170 = vector.broadcast %5 : vector<1x96xf32> to vector<8x96xf32>
    %171 = arith.addf %169, %170 : vector<8x96xf32>
    %cst_53 = arith.constant dense<0.000000e+00> : vector<8x96xf32>
    %172 = tpu.matmul %122, %3, %cst_53 {dimension_numbers = #tpu.dot_dimension_numbers<[1], [0], [0], [1], [0, 0, 1, 1], [], []>} : vector<8x32xf32>, vector<32x96xf32>, vector<8x96xf32> -> vector<8x96xf32>
    %173 = vector.extract_strided_slice %171 {offsets = [0, 0], sizes = [8, 32], strides = [1, 1]} : vector<8x96xf32> to vector<8x32xf32>
    %174 = vector.extract_strided_slice %172 {offsets = [0, 0], sizes = [8, 32], strides = [1, 1]} : vector<8x96xf32> to vector<8x32xf32>
    %175 = arith.addf %173, %174 : vector<8x32xf32>
    %176 = arith.negf %175 : vector<8x32xf32>
    %177 = math.exp %176 : vector<8x32xf32>
    %cst_54 = arith.constant 1.000000e+00 : f32
    %178 = vector.broadcast %cst_54 : f32 to vector<8x32xf32>
    %179 = arith.addf %178, %177 : vector<8x32xf32>
    %180 = arith.divf %178, %179 : vector<8x32xf32>
    %181 = vector.extract_strided_slice %171 {offsets = [0, 32], sizes = [8, 32], strides = [1, 1]} : vector<8x96xf32> to vector<8x32xf32>
    %182 = vector.extract_strided_slice %172 {offsets = [0, 32], sizes = [8, 32], strides = [1, 1]} : vector<8x96xf32> to vector<8x32xf32>
    %183 = arith.addf %181, %182 : vector<8x32xf32>
    %184 = arith.negf %183 : vector<8x32xf32>
    %185 = math.exp %184 : vector<8x32xf32>
    %cst_55 = arith.constant 1.000000e+00 : f32
    %186 = vector.broadcast %cst_55 : f32 to vector<8x32xf32>
    %187 = arith.addf %186, %185 : vector<8x32xf32>
    %188 = arith.divf %186, %187 : vector<8x32xf32>
    %189 = vector.extract_strided_slice %171 {offsets = [0, 64], sizes = [8, 32], strides = [1, 1]} : vector<8x96xf32> to vector<8x32xf32>
    %190 = vector.extract_strided_slice %172 {offsets = [0, 64], sizes = [8, 32], strides = [1, 1]} : vector<8x96xf32> to vector<8x32xf32>
    %191 = vector.broadcast %7 : vector<1x32xf32> to vector<8x32xf32>
    %192 = arith.addf %190, %191 : vector<8x32xf32>
    %193 = arith.mulf %180, %192 : vector<8x32xf32>
    %194 = arith.addf %189, %193 : vector<8x32xf32>
    %195 = math.tanh %194 : vector<8x32xf32>
    %cst_56 = arith.constant 1.000000e+00 : f32
    %196 = vector.broadcast %cst_56 : f32 to vector<8x32xf32>
    %197 = arith.subf %196, %188 : vector<8x32xf32>
    %198 = arith.mulf %197, %195 : vector<8x32xf32>
    %199 = arith.mulf %188, %122 : vector<8x32xf32>
    %200 = arith.addf %198, %199 : vector<8x32xf32>
    %201 = arith.index_cast %c2_i32 : i32 to index
    %c0_57 = arith.constant 0 : index
    %c0_58 = arith.constant 0 : index
    %202 = vector.load %arg9[%201, %c0_57, %c0_58] : memref<4x8x32xf32, #tpu.memory_space<vmem>>, vector<1x8x32xf32>
    %203 = vector.shape_cast %202 : vector<1x8x32xf32> to vector<8x32xf32>
    %204 = vector.shape_cast %200 : vector<8x32xf32> to vector<1x8x32xf32>
    tpu.vector_store %arg9[%201, %c0_57, %c0_58], %204 {strides = array<i32>} : memref<4x8x32xf32, #tpu.memory_space<vmem>>, vector<1x8x32xf32>,
    %c3_i32_59 = arith.constant 3 : i32
    %205 = arith.subi %c3_i32_59, %c2_i32 : i32
    %206 = arith.index_cast %205 : i32 to index
    %c0_60 = arith.constant 0 : index
    %c0_61 = arith.constant 0 : index
    %207 = vector.load %arg2[%206, %c0_60, %c0_61] : memref<4x8x96xf32, #tpu.memory_space<vmem>>, vector<1x8x96xf32>
    %208 = vector.shape_cast %207 : vector<1x8x96xf32> to vector<8x96xf32>
    %209 = vector.broadcast %6 : vector<1x96xf32> to vector<8x96xf32>
    %210 = arith.addf %208, %209 : vector<8x96xf32>
    %cst_62 = arith.constant dense<0.000000e+00> : vector<8x96xf32>
    %211 = tpu.matmul %161, %4, %cst_62 {dimension_numbers = #tpu.dot_dimension_numbers<[1], [0], [0], [1], [0, 0, 1, 1], [], []>} : vector<8x32xf32>, vector<32x96xf32>, vector<8x96xf32> -> vector<8x96xf32>
    %212 = vector.extract_strided_slice %210 {offsets = [0, 0], sizes = [8, 32], strides = [1, 1]} : vector<8x96xf32> to vector<8x32xf32>
    %213 = vector.extract_strided_slice %211 {offsets = [0, 0], sizes = [8, 32], strides = [1, 1]} : vector<8x96xf32> to vector<8x32xf32>
    %214 = arith.addf %212, %213 : vector<8x32xf32>
    %215 = arith.negf %214 : vector<8x32xf32>
    %216 = math.exp %215 : vector<8x32xf32>
    %cst_63 = arith.constant 1.000000e+00 : f32
    %217 = vector.broadcast %cst_63 : f32 to vector<8x32xf32>
    %218 = arith.addf %217, %216 : vector<8x32xf32>
    %219 = arith.divf %217, %218 : vector<8x32xf32>
    %220 = vector.extract_strided_slice %210 {offsets = [0, 32], sizes = [8, 32], strides = [1, 1]} : vector<8x96xf32> to vector<8x32xf32>
    %221 = vector.extract_strided_slice %211 {offsets = [0, 32], sizes = [8, 32], strides = [1, 1]} : vector<8x96xf32> to vector<8x32xf32>
    %222 = arith.addf %220, %221 : vector<8x32xf32>
    %223 = arith.negf %222 : vector<8x32xf32>
    %224 = math.exp %223 : vector<8x32xf32>
    %cst_64 = arith.constant 1.000000e+00 : f32
    %225 = vector.broadcast %cst_64 : f32 to vector<8x32xf32>
    %226 = arith.addf %225, %224 : vector<8x32xf32>
    %227 = arith.divf %225, %226 : vector<8x32xf32>
    %228 = vector.extract_strided_slice %210 {offsets = [0, 64], sizes = [8, 32], strides = [1, 1]} : vector<8x96xf32> to vector<8x32xf32>
    %229 = vector.extract_strided_slice %211 {offsets = [0, 64], sizes = [8, 32], strides = [1, 1]} : vector<8x96xf32> to vector<8x32xf32>
    %230 = vector.broadcast %8 : vector<1x32xf32> to vector<8x32xf32>
    %231 = arith.addf %229, %230 : vector<8x32xf32>
    %232 = arith.mulf %219, %231 : vector<8x32xf32>
    %233 = arith.addf %228, %232 : vector<8x32xf32>
    %234 = math.tanh %233 : vector<8x32xf32>
    %cst_65 = arith.constant 1.000000e+00 : f32
    %235 = vector.broadcast %cst_65 : f32 to vector<8x32xf32>
    %236 = arith.subf %235, %227 : vector<8x32xf32>
    %237 = arith.mulf %236, %234 : vector<8x32xf32>
    %238 = arith.mulf %227, %161 : vector<8x32xf32>
    %239 = arith.addf %237, %238 : vector<8x32xf32>
    %c3_i32_66 = arith.constant 3 : i32
    %240 = arith.subi %c3_i32_66, %c2_i32 : i32
    %241 = arith.index_cast %240 : i32 to index
    %c0_67 = arith.constant 0 : index
    %c0_68 = arith.constant 0 : index
    %242 = vector.load %arg10[%241, %c0_67, %c0_68] : memref<4x8x32xf32, #tpu.memory_space<vmem>>, vector<1x8x32xf32>
    %243 = vector.shape_cast %242 : vector<1x8x32xf32> to vector<8x32xf32>
    %244 = vector.shape_cast %239 : vector<8x32xf32> to vector<1x8x32xf32>
    tpu.vector_store %arg10[%241, %c0_67, %c0_68], %244 {strides = array<i32>} : memref<4x8x32xf32, #tpu.memory_space<vmem>>, vector<1x8x32xf32>,
    %c3_i32_69 = arith.constant 3 : i32
    %245 = arith.index_cast %c3_i32_69 : i32 to index
    %c0_70 = arith.constant 0 : index
    %c0_71 = arith.constant 0 : index
    %246 = vector.load %arg1[%245, %c0_70, %c0_71] : memref<4x8x96xf32, #tpu.memory_space<vmem>>, vector<1x8x96xf32>
    %247 = vector.shape_cast %246 : vector<1x8x96xf32> to vector<8x96xf32>
    %248 = vector.broadcast %5 : vector<1x96xf32> to vector<8x96xf32>
    %249 = arith.addf %247, %248 : vector<8x96xf32>
    %cst_72 = arith.constant dense<0.000000e+00> : vector<8x96xf32>
    %250 = tpu.matmul %200, %3, %cst_72 {dimension_numbers = #tpu.dot_dimension_numbers<[1], [0], [0], [1], [0, 0, 1, 1], [], []>} : vector<8x32xf32>, vector<32x96xf32>, vector<8x96xf32> -> vector<8x96xf32>
    %251 = vector.extract_strided_slice %249 {offsets = [0, 0], sizes = [8, 32], strides = [1, 1]} : vector<8x96xf32> to vector<8x32xf32>
    %252 = vector.extract_strided_slice %250 {offsets = [0, 0], sizes = [8, 32], strides = [1, 1]} : vector<8x96xf32> to vector<8x32xf32>
    %253 = arith.addf %251, %252 : vector<8x32xf32>
    %254 = arith.negf %253 : vector<8x32xf32>
    %255 = math.exp %254 : vector<8x32xf32>
    %cst_73 = arith.constant 1.000000e+00 : f32
    %256 = vector.broadcast %cst_73 : f32 to vector<8x32xf32>
    %257 = arith.addf %256, %255 : vector<8x32xf32>
    %258 = arith.divf %256, %257 : vector<8x32xf32>
    %259 = vector.extract_strided_slice %249 {offsets = [0, 32], sizes = [8, 32], strides = [1, 1]} : vector<8x96xf32> to vector<8x32xf32>
    %260 = vector.extract_strided_slice %250 {offsets = [0, 32], sizes = [8, 32], strides = [1, 1]} : vector<8x96xf32> to vector<8x32xf32>
    %261 = arith.addf %259, %260 : vector<8x32xf32>
    %262 = arith.negf %261 : vector<8x32xf32>
    %263 = math.exp %262 : vector<8x32xf32>
    %cst_74 = arith.constant 1.000000e+00 : f32
    %264 = vector.broadcast %cst_74 : f32 to vector<8x32xf32>
    %265 = arith.addf %264, %263 : vector<8x32xf32>
    %266 = arith.divf %264, %265 : vector<8x32xf32>
    %267 = vector.extract_strided_slice %249 {offsets = [0, 64], sizes = [8, 32], strides = [1, 1]} : vector<8x96xf32> to vector<8x32xf32>
    %268 = vector.extract_strided_slice %250 {offsets = [0, 64], sizes = [8, 32], strides = [1, 1]} : vector<8x96xf32> to vector<8x32xf32>
    %269 = vector.broadcast %7 : vector<1x32xf32> to vector<8x32xf32>
    %270 = arith.addf %268, %269 : vector<8x32xf32>
    %271 = arith.mulf %258, %270 : vector<8x32xf32>
    %272 = arith.addf %267, %271 : vector<8x32xf32>
    %273 = math.tanh %272 : vector<8x32xf32>
    %cst_75 = arith.constant 1.000000e+00 : f32
    %274 = vector.broadcast %cst_75 : f32 to vector<8x32xf32>
    %275 = arith.subf %274, %266 : vector<8x32xf32>
    %276 = arith.mulf %275, %273 : vector<8x32xf32>
    %277 = arith.mulf %266, %200 : vector<8x32xf32>
    %278 = arith.addf %276, %277 : vector<8x32xf32>
    %279 = arith.index_cast %c3_i32_69 : i32 to index
    %c0_76 = arith.constant 0 : index
    %c0_77 = arith.constant 0 : index
    %280 = vector.load %arg9[%279, %c0_76, %c0_77] : memref<4x8x32xf32, #tpu.memory_space<vmem>>, vector<1x8x32xf32>
    %281 = vector.shape_cast %280 : vector<1x8x32xf32> to vector<8x32xf32>
    %282 = vector.shape_cast %278 : vector<8x32xf32> to vector<1x8x32xf32>
    tpu.vector_store %arg9[%279, %c0_76, %c0_77], %282 {strides = array<i32>} : memref<4x8x32xf32, #tpu.memory_space<vmem>>, vector<1x8x32xf32>,
    %c3_i32_78 = arith.constant 3 : i32
    %283 = arith.subi %c3_i32_78, %c3_i32_69 : i32
    %284 = arith.index_cast %283 : i32 to index
    %c0_79 = arith.constant 0 : index
    %c0_80 = arith.constant 0 : index
    %285 = vector.load %arg2[%284, %c0_79, %c0_80] : memref<4x8x96xf32, #tpu.memory_space<vmem>>, vector<1x8x96xf32>
    %286 = vector.shape_cast %285 : vector<1x8x96xf32> to vector<8x96xf32>
    %287 = vector.broadcast %6 : vector<1x96xf32> to vector<8x96xf32>
    %288 = arith.addf %286, %287 : vector<8x96xf32>
    %cst_81 = arith.constant dense<0.000000e+00> : vector<8x96xf32>
    %289 = tpu.matmul %239, %4, %cst_81 {dimension_numbers = #tpu.dot_dimension_numbers<[1], [0], [0], [1], [0, 0, 1, 1], [], []>} : vector<8x32xf32>, vector<32x96xf32>, vector<8x96xf32> -> vector<8x96xf32>
    %290 = vector.extract_strided_slice %288 {offsets = [0, 0], sizes = [8, 32], strides = [1, 1]} : vector<8x96xf32> to vector<8x32xf32>
    %291 = vector.extract_strided_slice %289 {offsets = [0, 0], sizes = [8, 32], strides = [1, 1]} : vector<8x96xf32> to vector<8x32xf32>
    %292 = arith.addf %290, %291 : vector<8x32xf32>
    %293 = arith.negf %292 : vector<8x32xf32>
    %294 = math.exp %293 : vector<8x32xf32>
    %cst_82 = arith.constant 1.000000e+00 : f32
    %295 = vector.broadcast %cst_82 : f32 to vector<8x32xf32>
    %296 = arith.addf %295, %294 : vector<8x32xf32>
    %297 = arith.divf %295, %296 : vector<8x32xf32>
    %298 = vector.extract_strided_slice %288 {offsets = [0, 32], sizes = [8, 32], strides = [1, 1]} : vector<8x96xf32> to vector<8x32xf32>
    %299 = vector.extract_strided_slice %289 {offsets = [0, 32], sizes = [8, 32], strides = [1, 1]} : vector<8x96xf32> to vector<8x32xf32>
    %300 = arith.addf %298, %299 : vector<8x32xf32>
    %301 = arith.negf %300 : vector<8x32xf32>
    %302 = math.exp %301 : vector<8x32xf32>
    %cst_83 = arith.constant 1.000000e+00 : f32
    %303 = vector.broadcast %cst_83 : f32 to vector<8x32xf32>
    %304 = arith.addf %303, %302 : vector<8x32xf32>
    %305 = arith.divf %303, %304 : vector<8x32xf32>
    %306 = vector.extract_strided_slice %288 {offsets = [0, 64], sizes = [8, 32], strides = [1, 1]} : vector<8x96xf32> to vector<8x32xf32>
    %307 = vector.extract_strided_slice %289 {offsets = [0, 64], sizes = [8, 32], strides = [1, 1]} : vector<8x96xf32> to vector<8x32xf32>
    %308 = vector.broadcast %8 : vector<1x32xf32> to vector<8x32xf32>
    %309 = arith.addf %307, %308 : vector<8x32xf32>
    %310 = arith.mulf %297, %309 : vector<8x32xf32>
    %311 = arith.addf %306, %310 : vector<8x32xf32>
    %312 = math.tanh %311 : vector<8x32xf32>
    %cst_84 = arith.constant 1.000000e+00 : f32
    %313 = vector.broadcast %cst_84 : f32 to vector<8x32xf32>
    %314 = arith.subf %313, %305 : vector<8x32xf32>
    %315 = arith.mulf %314, %312 : vector<8x32xf32>
    %316 = arith.mulf %305, %239 : vector<8x32xf32>
    %317 = arith.addf %315, %316 : vector<8x32xf32>
    %c3_i32_85 = arith.constant 3 : i32
    %318 = arith.subi %c3_i32_85, %c3_i32_69 : i32
    %319 = arith.index_cast %318 : i32 to index
    %c0_86 = arith.constant 0 : index
    %c0_87 = arith.constant 0 : index
    %320 = vector.load %arg10[%319, %c0_86, %c0_87] : memref<4x8x32xf32, #tpu.memory_space<vmem>>, vector<1x8x32xf32>
    %321 = vector.shape_cast %320 : vector<1x8x32xf32> to vector<8x32xf32>
    %322 = vector.shape_cast %317 : vector<8x32xf32> to vector<1x8x32xf32>
    tpu.vector_store %arg10[%319, %c0_86, %c0_87], %322 {strides = array<i32>} : memref<4x8x32xf32, #tpu.memory_space<vmem>>, vector<1x8x32xf32>,
    %c4_i32 = arith.constant 4 : i32
    %c0_88 = arith.constant 0 : index
    %c0_89 = arith.constant 0 : index
    %323 = vector.load %arg11[%c0_88, %c0_89] : memref<8x32xf32, #tpu.memory_space<vmem>>, vector<8x32xf32>
    tpu.vector_store %arg11[%c0_88, %c0_89], %278 {strides = array<i32>} : memref<8x32xf32, #tpu.memory_space<vmem>>, vector<8x32xf32>,
    %c0_90 = arith.constant 0 : index
    %c0_91 = arith.constant 0 : index
    %324 = vector.load %arg12[%c0_90, %c0_91] : memref<8x32xf32, #tpu.memory_space<vmem>>, vector<8x32xf32>
    tpu.vector_store %arg12[%c0_90, %c0_91], %317 {strides = array<i32>} : memref<8x32xf32, #tpu.memory_space<vmem>>, vector<8x32xf32>,
    return
  }
  func.func @transform_0(%arg0: i32) -> (i32, i32, i32) {
    %c0_i32 = arith.constant 0 : i32
    %c0_i32_0 = arith.constant 0 : i32
    %c0_i32_1 = arith.constant 0 : i32
    return %arg0, %c0_i32, %c0_i32_0 : i32, i32, i32
  }
  func.func @transform_1(%arg0: i32) -> (i32, i32, i32) {
    %c1_i32 = arith.constant 1 : i32
    %0 = arith.subi %c1_i32, %arg0 : i32
    %c0_i32 = arith.constant 0 : i32
    %c0_i32_0 = arith.constant 0 : i32
    %c0_i32_1 = arith.constant 0 : i32
    return %0, %c0_i32, %c0_i32_0 : i32, i32, i32
  }
  func.func @transform_2(%arg0: i32) -> (i32, i32) {
    %c0_i32 = arith.constant 0 : i32
    %c0_i32_0 = arith.constant 0 : i32
    %c0_i32_1 = arith.constant 0 : i32
    return %c0_i32, %c0_i32_0 : i32, i32
  }
  func.func @transform_3(%arg0: i32) -> (i32, i32) {
    %c0_i32 = arith.constant 0 : i32
    %c0_i32_0 = arith.constant 0 : i32
    %c0_i32_1 = arith.constant 0 : i32
    return %c0_i32, %c0_i32_0 : i32, i32
  }
  func.func @transform_4(%arg0: i32) -> (i32, i32) {
    %c0_i32 = arith.constant 0 : i32
    %c0_i32_0 = arith.constant 0 : i32
    %c0_i32_1 = arith.constant 0 : i32
    return %c0_i32, %c0_i32_0 : i32, i32
  }
  func.func @transform_5(%arg0: i32) -> (i32, i32) {
    %c0_i32 = arith.constant 0 : i32
    %c0_i32_0 = arith.constant 0 : i32
    %c0_i32_1 = arith.constant 0 : i32
    return %c0_i32, %c0_i32_0 : i32, i32
  }
  func.func @transform_6(%arg0: i32) -> (i32, i32) {
    %c0_i32 = arith.constant 0 : i32
    %c0_i32_0 = arith.constant 0 : i32
    %c0_i32_1 = arith.constant 0 : i32
    return %c0_i32, %c0_i32_0 : i32, i32
  }
  func.func @transform_7(%arg0: i32) -> (i32, i32) {
    %c0_i32 = arith.constant 0 : i32
    %c0_i32_0 = arith.constant 0 : i32
    %c0_i32_1 = arith.constant 0 : i32
    return %c0_i32, %c0_i32_0 : i32, i32
  }
  func.func @transform_8(%arg0: i32) -> (i32, i32, i32) {
    %c0_i32 = arith.constant 0 : i32
    %c0_i32_0 = arith.constant 0 : i32
    %c0_i32_1 = arith.constant 0 : i32
    return %arg0, %c0_i32, %c0_i32_0 : i32, i32, i32
  }
  func.func @transform_9(%arg0: i32) -> (i32, i32, i32) {
    %c1_i32 = arith.constant 1 : i32
    %0 = arith.subi %c1_i32, %arg0 : i32
    %c0_i32 = arith.constant 0 : i32
    %c0_i32_0 = arith.constant 0 : i32
    %c0_i32_1 = arith.constant 0 : i32
    return %0, %c0_i32, %c0_i32_0 : i32, i32, i32
  }
}

</mosaic_0001>

<bundles_post_ra>
// kernel: tpu_custom_call.1
= control target key start
LH: loop header
LB: loop body
LE: loop exit
PB: predicated region body
PF: predicated region fallthrough
CT: control target
= control target key end

     0   :  { %s2861_s0 = inlined_call_operand.hbm [shape: f32[8,8,96], index: 0, kind: input, shape index: {}]   ;;  %s2862_s1 = inlined_call_operand.hbm [shape: f32[8,8,96], index: 1, kind: input, shape index: {}]   ;;  %s2863_s2 = inlined_call_operand.hbm [shape: f32[32,96], index: 2, kind: input, shape index: {}]   ;;  %s2864_s3 = inlined_call_operand.hbm [shape: f32[32,96], index: 3, kind: input, shape index: {}]   ;;  %s2865_s4 = inlined_call_operand.vmem [shape: f32[1,96], index: 4, kind: input, shape index: {}]   ;;  %s2866_s5 = inlined_call_operand.vmem [shape: f32[1,96], index: 5, kind: input, shape index: {}]   ;;  %s2867_s6 = inlined_call_operand.vmem [shape: f32[1,32], index: 6, kind: input, shape index: {}]   ;;  %s2868_s7 = inlined_call_operand.vmem [shape: f32[1,32], index: 7, kind: input, shape index: {}]   ;;  %s2869_s8 = inlined_call_operand.hbm [shape: f32[8,8,32], index: 8, kind: output, shape index: {0}]   ;;  %s2870_s9 = inlined_call_operand.hbm [shape: f32[8,8,32], index: 9, kind: output, shape index: {1}]  }
   0x1   :  { %2888 = sst [smem:[#allocation25_spill]] %s2861_s0 }
   0x2   :  { %2889 = sst [smem:[#allocation26_spill]] %s2863_s2 }
   0x3   :  { %2890 = sst [smem:[#allocation27_spill]] %s2864_s3 }
   0x4   :  { %2891 = sst [smem:[#allocation28_spill]] %s2869_s8 }
   0x5   :  { %2892 = sst [smem:[#allocation29_spill]] %s2870_s9 }
   0x6   :  { %15 = vsyncpa [#allocation5], 0 }
   0x7   :  { %17 = vsyncpa [#allocation5 + $0x1], 0 }
   0x8   :  { %18 = vsyncpa [#allocation8], 0 }
   0x9   :  { %20 = vsyncpa [#allocation8 + $0x1], 0 }
   0xa   :  { %21 = vsyncpa [#allocation11], 0 }
   0xb   :  { %22 = vsyncpa [#allocation6], 0 }
   0xc   :  { %24 = vsyncpa [#allocation6 + $0x1], 0 }
   0xd   :  { %25 = vsyncpa [#allocation14], 0 }
   0xe   :  { %27 = vsyncpa [#allocation14 + $0x1], 0  ;;  %s2263_s30 = smov 0   ;;  %s2265_s10 = smov 0  }
   0xf   :  { %s2267_s11 = smov 0   ;;  %s2269_s12 = smov 0  }
  0x10   :  { %s2271_s13 = smov 0   ;;  %s2273_s14 = smov 0  }
  0x11   :  { %s2275_s15 = smov 0  }
  0x12 LB: > { %2893 = sst [smem:[#allocation21_spill]] %s2170_s30  ;;  %s2299_s16 = sadd.s32 4294967295, %s2194_s15   ;;  %s2194_s15 = sphi %s2275_s15, %s2944_s15   ;;  %s2190_s14 = sphi %s2273_s14, %s2943_s14   ;;  %s2186_s13 = sphi %s2271_s13, %s2942_s13   ;;  %s2182_s12 = sphi %s2269_s12, %s2941_s12   ;;  %s2178_s11 = sphi %s2267_s11, %s2940_s11   ;;  %s2174_s10 = sphi %s2265_s10, %s2939_s10   ;;  %s2170_s30 = sphi %s2263_s30, %s2938_s30  }
  0x13   : > { %2894 = sst [smem:[#allocation22_spill]] %s2182_s12  ;;  %s1545_s17 = sadd.s32 4294967294, %s2194_s15  }
  0x14   : > { %p53_p0 = scmp.ne.s32.totalorder %s2186_s13, %s2182_s12  ;;  %p2875_p1 = scmp.eq.s32.totalorder %s2299_s16, 0 }
  0x15   : > { %p81_p2 = scmp.ne.s32.totalorder %s2174_s10, %s2170_s30  ;;  %p237_p5 = scmp.eq.s32.totalorder %s1545_s17, 1 }
  0x16   : > { %p2310_p4 = por %p2875_p1, %p53_p0  ;;  %p1546_p7 = scmp.ge.s32.totalorder %s2194_s15, 1 }
  0x17   : > { %p2316_p6 = por %p81_p2, %p2875_p1  ;;  %p2321_p8 = por %p237_p5, %p53_p0 }
  0x18   : > { %s2895_s18 = scalar_select %p2310_p4, 1, 0 }
  0x19   : > { %s2896_s19 = scalar_select %p2316_p6, 1, 0 }
  0x1a   : > { %s2897_s20 = scalar_select %p2321_p8, 1, 0 }
  0x1b   : > { %p2325_p9 = por %p237_p5, %p81_p2  ;;  %p272_p10 = scmp.lt.s32.totalorder %s2194_s15, 3 }
  0x1c   : > { %2898 = sst [smem:[#allocation23_spill]] %s2897_s20  ;;  %s2196_s23 = smov [#allocation9]  }
  0x1d   : > { %s2899_s21 = scalar_select %p2325_p9, 1, 0 }
  0x1e   : > { %p2331_p12 = pnand %p1546_p7, %p272_p10  ;;  %s284_s24 = sshll.u32 %s2196_s23, 4  ;;  %s2335_s24 = int_to_ptr.vmem [resolvable:$true] %s284_s24 }
  0x1f   : > { %2900 = sst [smem:[#allocation24_spill]] %s2899_s21  ;;  %s2197_s26 = smov [#allocation10]  }
  0x20   : > { %p1800_p13 = pneg %p2331_p12  ;;  %s297_s27 = sshll.u32 %s2197_s26, 4  ;;  %s2346_s27 = int_to_ptr.vmem [resolvable:$true] %s297_s27 }
  0x21   : > { %s2903_s2 = sld [smem:[#allocation26_spill]] }
  0x22   : > { %p2342_p3 = pnand %p1800_p13, %p2875_p1 }
  0x24   : > { %p1946_p5 = pneg %p2342_p3 }
  0x27   : > { %s1944_s23 = scalar_lea.hbm %s2903_s2, 512 }
  0x28   : > { %p1945_p2 = scmp.ne.s32.totalorder %s2903_s2, %s1944_s23  ;;  %p1951_p13 = scmp.lt.u32.totalorder %s1944_s23, %s2903_s2 }
  0x2a   : > { %p1947_p7 = pnand %p1946_p5, %p1945_p2 }
  0x2c   : > { %p1948_p10 = pneg %p1947_p7 }
  0x2e   : > { %p1953_p0 = pnand %p1951_p13, %p1948_p10 }
  0x30   : > { %1956 = shalt.err (!%p1953_p0)
}
  0x31   : > { %s1957_s26 = scalar_lea.vmem %s2335_s24, 512  ;;  %p1965_p8 = scmp.lt.s32.totalorder %s2335_s24, %s2335_s24 }
  0x32   : > { %p1958_p11 = scmp.ne.s32.totalorder %s2335_s24, %s1957_s26  ;;  %p1966_p2 = scmp.lt.s32.totalorder %s1957_s26, %s1957_s26 }
  0x34   : > { %p1960_p1 = pnand %p1958_p11, %p1946_p5  ;;  %p1967_p7 = por %p1966_p2, %p1965_p8 }
  0x36   : > { %p1961_p9 = pneg %p1960_p1 }
  0x38   : > { %p1968_p6 = pnand %p1967_p7, %p1961_p9 }
  0x3a   : > { %1971 = shalt.err (!%p1968_p6)
}
  0x3b   : > { %s2879_s30 = smov 128   ;;  %s2885_s12 = smov 8  }
  0x3c   : > { %1803 = dma.hbm_to_vmem [thread:$0]  (!%p2342_p3), %s2903_s2, 512, %s2335_s24, [#allocation8], %s2879_s30, %s2879_s30, %s2885_s12  }
  0x3d   : > { %s2904_s3 = sld [smem:[#allocation27_spill]] }
  0x43   : > { %s1972_s23 = scalar_lea.hbm %s2904_s3, 512 }
  0x44   : > { %p1973_p1 = scmp.ne.s32.totalorder %s2904_s3, %s1972_s23  ;;  %p1979_p9 = scmp.lt.u32.totalorder %s1972_s23, %s2904_s3 }
  0x46   : > { %p1975_p6 = pnand %p1973_p1, %p1946_p5 }
  0x48   : > { %p1976_p8 = pneg %p1975_p6 }
  0x4a   : > { %p1981_p11 = pnand %p1979_p9, %p1976_p8 }
  0x4c   : > { %1984 = shalt.err (!%p1981_p11)
}
  0x4d   : > { %s1985_s24 = scalar_lea.vmem %s2346_s27, 512  ;;  %p1993_p2 = scmp.lt.s32.totalorder %s2346_s27, %s2346_s27 }
  0x4e   : > { %p1986_p0 = scmp.ne.s32.totalorder %s2346_s27, %s1985_s24  ;;  %p1994_p7 = scmp.lt.s32.totalorder %s1985_s24, %s1985_s24 }
  0x50   : > { %p1988_p10 = pnand %p1986_p0, %p1946_p5  ;;  %p1995_p1 = por %p1994_p7, %p1993_p2 }
  0x52   : > { %p1989_p13 = pneg %p1988_p10 }
  0x54   : > { %p1996_p6 = pnand %p1995_p1, %p1989_p13 }
  0x56   : > { %1999 = shalt.err (!%p1996_p6)
}
  0x57   : > { %1806 = dma.hbm_to_vmem [thread:$0]  (!%p2342_p3), %s2904_s3, 512, %s2346_s27, [#allocation11], %s2879_s30, %s2879_s30, %s2885_s12  }
  0x58   : > { %p47_p5 = scmp.ne.s32.totalorder %s2190_s14, %s2186_s13  ;;  %p2882_p8 = scmp.eq.s32.totalorder %s2194_s15, 0 }
  0x59   : > { %p2881_p9 = scmp.lt.s32.totalorder %s2194_s15, 2  ;;  %s323_s25 = sand.u32 1, %s2190_s14  }
  0x5a   : > { %p49_p11 = por %p2882_p8, %p47_p5  ;;  %p2905_p0 = scmp.eq.s32.totalorder %s2299_s16, 1 }
  0x5b   : > { %s1550_s20 = sshll.u32 %s323_s25, 5  ;;  %s1604_s21 = sshll.u32 %s2194_s15, 9 }
  0x5c   : > { %p2416_p10 = por %p2905_p0, %p47_p5  ;;  %s2907_s0 = sld [smem:[#allocation25_spill]] }
  0x5d   : > { %s327_s27 = scalar_lea.vmem [#allocation4], %s1550_s20  ;;  %p2430_p3 = pnand %p2881_p9, %p49_p11 }
  0x5e   : > { %s2906_s28 = scalar_select %p2416_p10, 1, 0 }
  0x5f   : > { %s334_s26 = sshll.u32 %s327_s27, 4  ;;  %s2435_s8 = sadd.s32 1, %s2194_s15   ;;  %s2426_s26 = int_to_ptr.vmem [resolvable:$true] %s334_s26 }
  0x60   : > { %s2437_s9 = scalar_lea.sflag [#allocation5], %s323_s25  ;;  %p2002_p2 = pneg %p2430_p3 }
  0x62   : > { %s2424_s23 = scalar_lea.hbm %s2907_s0, %s1604_s21  ;;  %s2005_s17 = scalar_lea.hbm %s2907_s0, 1024 }
  0x63   : > { %s2000_s21 = scalar_lea.hbm %s2424_s23, 512  ;;  %p2006_p6 = scmp.lt.u32.totalorder %s2424_s23, %s2907_s0 }
  0x64   : > { %p2001_p13 = scmp.ne.s32.totalorder %s2424_s23, %s2000_s21  ;;  %p2007_p5 = scmp.lt.u32.totalorder %s2005_s17, %s2000_s21 }
  0x65   : > { %p2009_p0 = scmp.lt.u32.totalorder %s2000_s21, %s2424_s23 }
  0x66   : > { %p2003_p7 = pnand %p2002_p2, %p2001_p13  ;;  %p2008_p11 = por %p2007_p5, %p2006_p6 }
  0x68   : > { %p2004_p1 = pneg %p2003_p7  ;;  %p2010_p9 = por %p2009_p0, %p2008_p11 }
  0x6a   : > { %p2011_p8 = pnand %p2010_p9, %p2004_p1 }
  0x6c   : > { %2014 = shalt.err (!%p2011_p8)
}
  0x6d   : > { %s2015_s25 = scalar_lea.vmem %s2426_s26, 512  ;;  %s2200_s20 = smov [#allocation4]  }
  0x6e   : > { %p2016_p13 = scmp.ne.s32.totalorder %s2426_s26, %s2015_s25  ;;  %s2020_s29 = sshll.u32 %s2200_s20, 4  ;;  %s2021_s29 = int_to_ptr.vmem [resolvable:$false] %s2020_s29 }
  0x6f   : > { %s2022_s30 = scalar_lea.vmem %s2021_s29, 1024  ;;  %p2023_p4 = scmp.lt.s32.totalorder %s2426_s26, %s2021_s29 }
  0x70   : > { %p2018_p7 = pnand %p2016_p13, %p2002_p2  ;;  %p2024_p6 = scmp.lt.s32.totalorder %s2022_s30, %s2015_s25 }
  0x72   : > { %p2019_p10 = pneg %p2018_p7  ;;  %p2025_p5 = por %p2024_p6, %p2023_p4 }
  0x74   : > { %p2026_p11 = pnand %p2025_p5, %p2019_p10 }
  0x76   : > { %2029 = shalt.err (!%p2026_p11)
}
  0x77   : > { %s2909_s21 = smov 128   ;;  %s37_s24 = ssub.s32 %s2194_s15, %s2435_s8 }
  0x78   : > { %1810 = dma.hbm_to_vmem [thread:$0]  (!%p2430_p3), %s2424_s23, 512, %s2426_s26, %s2437_s9, %s2909_s21, %s2909_s21, %s2885_s12  }
  0x79   : > { %s63_s17 = ssub.s32 1, %s2194_s15  ;;  %p38_p4 = scmp.eq.s32.totalorder %s37_s24, 0 }
  0x7a   : > { %s64_s27 = ssub.s32 1, %s2435_s8  ;;  %s68_s20 = sadd.s32 1, %s2178_s11 }
  0x7b   : > { %s65_s25 = ssub.s32 %s63_s17, %s64_s27  ;;  %s2910_s29 = sadd.s32 1, %s2190_s14 }
  0x7c   : > { %s2476_s30 = scalar_select %p38_p4, %s2190_s14, %s2910_s29  }
  0x7d   : > { %p66_p8 = scmp.eq.s32.totalorder %s65_s25, 0  ;;  %p75_p9 = scmp.ne.s32.totalorder %s2178_s11, %s2174_s10 }
  0x7e   : > { %s344_s0 = sand.u32 1, %s2194_s15   ;;  %s346_s2 = sand.u32 1, %s2178_s11  }
  0x7f   : > { %s2483_s3 = scalar_select %p66_p8, %s2178_s11, %s68_s20  }
  0x80   : > { %p2911_p10 = scmp.eq.s32.totalorder %s2194_s15, 0  ;;  %p2912_p1 = scmp.eq.s32.totalorder %s2299_s16, 1 }
  0x81   : > { %s1553_s26 = sshll.u32 %s346_s2, 5  ;;  %s1605_s9 = sshll.u32 %s63_s17, 9 }
  0x82   : > { %p77_p2 = por %p75_p9, %p2911_p10  ;;  %p2489_p3 = por %p2912_p1, %p75_p9 }
  0x83   : > { %s2496_s29 = scalar_lea.hbm %s2862_s1, %s1605_s9  ;;  %s348_s25 = scalar_lea.vmem [#allocation7], %s1553_s26 }
  0x84   : > { %s2913_s23 = scalar_select %p2489_p3, 1, 0 }
  0x85   : > { %s356_s20 = sshll.u32 %s348_s25, 4  ;;  %p2914_p0 = scmp.lt.s32.totalorder %s2194_s15, 2  ;;  %s2498_s20 = int_to_ptr.vmem [resolvable:$true] %s356_s20 }
  0x86   : > { %s2506_s2 = scalar_lea.sflag [#allocation8], %s344_s0  ;;  %s2030_s17 = scalar_lea.hbm %s2496_s29, 512 }
  0x87   : > { %p2502_p13 = pnand %p2914_p0, %p77_p2  ;;  %p2031_p7 = scmp.ne.s32.totalorder %s2496_s29, %s2030_s17 }
  0x88   : > { %s2035_s24 = scalar_lea.hbm %s2862_s1, 1024  ;;  %p2036_p4 = scmp.lt.u32.totalorder %s2496_s29, %s2862_s1 }
  0x89   : > { %p2032_p6 = pneg %p2502_p13  ;;  %p2037_p8 = scmp.lt.u32.totalorder %s2035_s24, %s2030_s17 }
  0x8a   : > { %p2039_p10 = scmp.lt.u32.totalorder %s2030_s17, %s2496_s29 }
  0x8b   : > { %p2033_p5 = pnand %p2032_p6, %p2031_p7  ;;  %p2038_p9 = por %p2037_p8, %p2036_p4 }
  0x8d   : > { %p2034_p11 = pneg %p2033_p5  ;;  %p2040_p2 = por %p2039_p10, %p2038_p9 }
  0x8f   : > { %p2041_p1 = pnand %p2040_p2, %p2034_p11 }
  0x91   : > { %2044 = shalt.err (!%p2041_p1)
}
  0x92   : > { %s2045_s0 = scalar_lea.vmem %s2498_s20, 512  ;;  %s2201_s26 = smov [#allocation7]  }
  0x93   : > { %p2046_p0 = scmp.ne.s32.totalorder %s2498_s20, %s2045_s0  ;;  %s2050_s9 = sshll.u32 %s2201_s26, 4  ;;  %s2051_s9 = int_to_ptr.vmem [resolvable:$false] %s2050_s9 }
  0x94   : > { %s2052_s27 = scalar_lea.vmem %s2051_s9, 1024  ;;  %p2053_p3 = scmp.lt.s32.totalorder %s2498_s20, %s2051_s9 }
  0x95   : > { %p2048_p7 = pnand %p2046_p0, %p2032_p6  ;;  %p2054_p4 = scmp.lt.s32.totalorder %s2052_s27, %s2045_s0 }
  0x97   : > { %p2049_p5 = pneg %p2048_p7  ;;  %p2055_p8 = por %p2054_p4, %p2053_p3 }
  0x99   : > { %p2056_p9 = pnand %p2055_p8, %p2049_p5 }
  0x9b   : > { %2059 = shalt.err (!%p2056_p9)
}
  0x9c   : > { %s2916_s17 = smov 8   ;;  %368 = sbr.rel (%p2331_p12) target bundleno = 3010 (0xbc2), region = 52 }
  0x9d   : > { %1813 = dma.hbm_to_vmem [thread:$0]  (!%p2502_p13), %s2496_s29, 512, %s2498_s20, %s2506_s2, %s2909_s21, %s2909_s21, %s2916_s17  }
  0x9e   : > { %s2540_s24 = sand.u32 (!%p2331_p12), 1, %s2186_s13   ;;  %p2917_p3 = scmp.ne.s32.totalorder (!%p2331_p12), %s2895_s18, 0 }
  0x9f   : > { %s1557_s25 = sshll.u32 (!%p2331_p12), %s2540_s24, 5  ;;  %s371_s0 = scalar_lea.sflag (!%p2331_p12), [#allocation5], %s2540_s24 }
  0xa0   : > { %s2544_s26 = scalar_lea.vmem (!%p2331_p12), [#allocation4], %s1557_s25 }
  0xa3   : > { %2145 = dma.done.wait (%p2917_p3), %s371_s0, 512  }
  0xa4   : > { %2147 = vsyncadd (%p2917_p3), %s371_s0, 4294966784  ;;  %s379_s22 = sand.u32 1, %s2299_s16   ;;  %s2887_s12 = sand.u32 1, %s2174_s10  }
  0xa5   : > { %s1558_s21 = sshll.u32 %s2887_s12, 5  ;;  %s380_s29 = scalar_lea.sflag [#allocation8], %s379_s22 }
  0xa6   : > { %s2554_s20 = scalar_lea.vmem [#allocation7], %s1558_s21  ;;  %p2918_p12 = scmp.ne.s32.totalorder %s2896_s19, 0 }
  0xa8   : > { %2149 = dma.done.wait (%p2918_p12), %s380_s29, 512  }
  0xa9   : > { %2151 = vsyncadd (%p2918_p12), %s380_s29, 4294966784  ;;  %p2919_p13 = scmp.eq.s32.totalorder %s2299_s16, 0 }
  0xab   : > { %2153 = dma.done.wait (%p2919_p13), [#allocation8], 512   ;;  %p2920_p6 = pmov %p2919_p13 }
  0xad   : > { %2155 = vsyncadd (%p2920_p6), [#allocation8], 4294966784  ;;  %p2921_p11 = pmov %p2920_p6 }
  0xae   : > { %p2922_p10 = pmov %p2920_p6 }
  0xaf   : > { %2157 = dma.done.wait (%p2921_p11), [#allocation11], 512  }
  0xb0   : > { %2159 = vsyncadd (%p2922_p10), [#allocation11], 4294966784  ;;  %s2568_s18 = scalar_lea.vmem [#allocation12], %s1557_s25  ;;  %s2570_s2 = scalar_lea.vmem [#allocation13], %s1558_s21 }
  0xb1   : > { %p2923_p2 = scmp.ne.s32.totalorder %s2299_s16, 0 }
  0xb2   : > { %vm446_vm0 = vcmask (!%p2923_p2), 261120   ;;  %v2202_v0 = vmov (!%p2923_p2), 0.0  }
  0xb3   : > { %445 = sbr.rel (%p2923_p2) target bundleno = 186 (0xba), region = 72  ;;  %447 = vst.msk [vmem:[#allocation2] sm:$0xff] (!%p2923_p2), %vm446_vm0, %v2202_v0  ;;  %448 = vst.msk [vmem:[#allocation3] sm:$0xff] (!%p2923_p2), %vm446_vm0, %v2202_v0 }
  0xba PF: > { %v449_v1 = vld [vmem:[#allocation9] sm:$0xff]  ;;  %v450_v2 = vld [vmem:[#allocation9 + $0x8] sm:$0xff]  ;;  %v2203_v4 = vmov 0.0|0.0   ;;  %v451_v7 = vld [vmem:[#allocation9 + $0x10] sm:$0xff]  ;;  %vm2204_vm1 = vmmov 0   ;;  %v2205_v10 = vmov 0.0  }
  0xbb   : > { %v453_v3 = vld [vmem:[#allocation10] sm:$0xff]  ;;  %1736 = vmatprep.subr.bf16.mxu0 %v2203_v4  ;;  %v2575_v5 = vpack.c.bf16 %v450_v2, %v449_v1  ;;  %1742 = vmatprep.subr.bf16.mxu1 %v2203_v4  ;;  %v454_v6 = vld [vmem:[#allocation10 + $0x8] sm:$0xff]  ;;  %v452_v8 = vld [vmem:[#allocation9 + $0x18] sm:$0xff]  ;;  %s2206_s27 = smov 64   ;;  %vm471_vm2 = vcmask 261120   ;;  %s2207_s19 = smov 32  }
  0xbc   : > { %v2578_v9 = vpack.c.bf16 %v454_v6, %v453_v3  ;;  %1656 = vmatprep.mubr.msk.f32.mxu0 %vm2204_vm1, %v2205_v10  ;;  %v455_v11 = vld [vmem:[#allocation10 + $0x10] sm:$0xff]  ;;  %v456_v12 = vld [vmem:[#allocation10 + $0x18] sm:$0xff]  ;;  %1667 = vmatprep.mubr.msk.f32.mxu1 %vm2204_vm1, %v2205_v10  ;;  %v2585_v13 = vpack.c.bf16 %v452_v8, %v451_v7  ;;  %v463_v28 = vld [vmem:[%s2544_s26] sm:$0xff]  ;;  %s2208_s9 = smov 96   ;;  %s2924_s0 = sld [smem:[#allocation28_spill]] }
  0xbd   : > { %1738 = vmatpush3.bf16.msra.mxu0 %v2575_v5  ;;  %v1567_v14 = vld [vmem:[%s2867_s6] ss:$0 sm:$0xff]  ;;  %v2592_v15 = vpack.c.bf16 %v456_v12, %v455_v11  ;;  %v462_v18 = vld [vmem:[#allocation3] sm:$0xff]  ;;  %s1398_s29 = sshll.u32 %s2570_s2, 4  ;;  %p2925_p0 = scmp.ne.s32.totalorder %s2906_s28, 0  ;;  %s2795_s29 = int_to_ptr.vmem [resolvable:$true] %s1398_s29 }
  0xbe   : > { %1739 = vmatprep.subr.bf16.mxu0 %v2203_v4  ;;  %1744 = vmatpush3.bf16.msra.mxu1 %v2578_v9  ;;  %v1572_v16 = vld [vmem:[%s2868_s7] ss:$0 sm:$0xff]  ;;  %v1568_v31 = vld [vmem:[%s2554_s20 + $0x18] sm:$0xff] }
  0xbf   : > { %1745 = vmatprep.subr.bf16.mxu1 %v2203_v4  ;;  %557 = vrot.lane.b32.xlu0 %v1567_v14, %s2206_s27  ;;  %v461_v17 = vld [vmem:[#allocation2] sm:$0xff]  ;;  %v1574_v14 = vld [vmem:[%s2544_s26 + $0x8] sm:$0xff] }
  0xc0   : > { %v2629_v27 = vld [vmem:[%s2865_s4] ss:$0 sm:$0xff] }
  0xc1   : > { %1741 = vmatpush3.bf16.msra.mxu0 %v2585_v13  ;;  %v470_v29 = vadd.f32 %v2629_v27, %v463_v28  ;;  %v2636_v30 = vld [vmem:[%s2866_s5] ss:$0 sm:$0xff] }
  0xc2   : > { %1747 = vmatpush3.bf16.msra.mxu1 %v2592_v15  ;;  %1748 = vmatprep.subr.bf16.mxu0 %v2203_v4  ;;  %v596_v33 = vadd.f32 %v2636_v30, %v1568_v31 }
  0xc3   : > { %682 = vrot.lane.b32.xlu0 %v1572_v16, %s2206_s27  ;;  %1754 = vmatprep.subr.bf16.mxu1 %v2203_v4  ;;  %v716_v16 = vadd.f32 %v1574_v14, %v2629_v27 }
  0xc4   : > { %1657 = vmatmul.mubr.msk.f32.vlgmr.msra.gmra.mrb[0].mxu0 %vm471_vm2, %v461_v17 }
  0xc5   : > { %1668 = vmatmul.mubr.msk.f32.vlgmr.msra.gmra.mrb[0].mxu1 %vm471_vm2, %v462_v18  ;;  %1750 = vmatpush3.bf16.msra.mxu0 %v2575_v5 }
  0xc6   : > { %1751 = vmatprep.subr.bf16.mxu0 %v2203_v4  ;;  %1756 = vmatpush3.bf16.msra.mxu1 %v2578_v9 }
  0xc7   : > { %1678 = vmatprep.mubr.msk.f32.mxu0 %vm2204_vm1, %v2205_v10  ;;  %1757 = vmatprep.subr.bf16.mxu1 %v2203_v4 }
  0xc8   : > { %1689 = vmatprep.mubr.msk.f32.mxu1 %vm2204_vm1, %v2205_v10 }
  0xc9   : > { %1753 = vmatpush3.bf16.msra.mxu0 %v2585_v13 }
  0xca   : > { %1759 = vmatpush3.bf16.msra.mxu1 %v2592_v15  ;;  %1760 = vmatprep.subr.bf16.mxu0 %v2203_v4 }
  0xcb   : > { %1766 = vmatprep.subr.bf16.mxu1 %v2203_v4 }
 0x131   : > { %v2618_v19 = vpop.permute.xlu0 %557 }
 0x135   : > { %v2620_v21 = vpop.permute.xlu0 %682 }
 0x197   : > { %v541_v20 = vpop.f32.mrb[0].mxu0 }
 0x198   : > { %v1658_v22 = vpop.f32.mrb[1].mxu0  ;;  %v666_v23 = vpop.f32.mrb[0].mxu1  ;;  %v560_v24 = vadd.f32 %v2618_v19, %v541_v20  ;;  %v545_v32 = vadd.f32 %v541_v20, %v470_v29 }
 0x199   : > { %v1669_v25 = vpop.f32.mrb[1].mxu1  ;;  %v685_v26 = vadd.f32 %v2620_v21, %v666_v23  ;;  %v670_v35 = vadd.f32 %v666_v23, %v596_v33 }
 0x19a   : > { %562 = vrot.lane.b32.xlu1 %v560_v24, %s2206_s27  ;;  %v1566_v34 = vmul.f32 -1.442695, %v545_v32 }
 0x19b   : > { %v1571_v36 = vmul.f32 -1.442695, %v670_v35 }
 0x19c   : > { %1896 = vpow2.f32 %v1566_v34 }
 0x19d   : > { %1898 = vpow2.f32 %v1571_v36 }
 0x19e   : > { %687 = vrot.lane.b32.xlu1 %v685_v26, %s2206_s27 }
 0x1a6   : > { %v1897_v37 = vpop.eup %1896 }
 0x1a7   : > { %v549_v38 = vadd.f32 1.0, %v1897_v37  ;;  %v1899_v39 = vpop.eup %1898 }
 0x1a8   : > { %v674_v40 = vadd.f32 1.0, %v1899_v39 }
 0x1a9   : > { %1900 = vrcp.f32 %v549_v38 }
 0x1aa   : > { %1902 = vrcp.f32 %v674_v40 }
 0x1b3   : > { %v1901_v41 = vpop.eup %1900 }
 0x1b4   : > { %v1903_v44 = vpop.eup %1902  ;;  %v572_v54 = vsub.f32 1.0, %v1901_v41 }
 0x1b5   : > { %v697_v60 = vsub.f32 1.0, %v1903_v44 }
 0x20c   : > { %v563_v42 = vpop.permute.xlu1 %562 }
 0x20d   : > { %v565_v43 = vmul.f32 %v1901_v41, %v563_v42 }
 0x20f   : > { %567 = vrot.lane.b32.xlu0 %v565_v43, %s2206_s27 }
 0x210   : > { %v688_v45 = vpop.permute.xlu1 %687 }
 0x211   : > { %v690_v46 = vmul.f32 %v1903_v44, %v688_v45 }
 0x213   : > { %692 = vrot.lane.b32.xlu1 %v690_v46, %s2206_s27 }
 0x217   : > { %578 = vrot.lane.b32.xlu1 %v461_v17, %s2207_s19  ;;  %v1578_v17 = vld [vmem:[%s2554_s20 + $0x10] sm:$0xff] }
 0x218   : > { %v824_v20 = vadd.f32 %v1578_v17, %v2636_v30 }
 0x21b   : > { %703 = vrot.lane.b32.xlu1 %v462_v18, %s2207_s19  ;;  %s1363_s19 = scalar_lea.sflag [#allocation6], %s2540_s24 }
 0x281   : > { %v568_v47 = vpop.permute.xlu0 %567 }
 0x282   : > { %v570_v48 = vadd.f32 %v568_v47, %v470_v29 }
 0x284   : > { %1904 = vtanh.f32 %v570_v48 }
 0x285   : > { %v693_v49 = vpop.permute.xlu1 %692 }
 0x286   : > { %v695_v50 = vadd.f32 %v693_v49, %v596_v33 }
 0x288   : > { %1906 = vtanh.f32 %v695_v50 }
 0x289   : > { %v579_v53 = vpop.permute.xlu1 %578 }
 0x28a   : > { %v581_v56 = vmul.f32 %v1901_v41, %v579_v53 }
 0x28d   : > { %v704_v58 = vpop.permute.xlu1 %703 }
 0x28e   : > { %v1905_v51 = vpop.eup %1904  ;;  %v706_v62 = vmul.f32 %v1903_v44, %v704_v58 }
 0x28f   : > { %574 = vrot.lane.b32.xlu0 %v1905_v51, %s2208_s9 }
 0x292   : > { %v1907_v52 = vpop.eup %1906 }
 0x293   : > { %699 = vrot.lane.b32.xlu0 %v1907_v52, %s2208_s9 }
 0x301   : > { %v575_v55 = vpop.permute.xlu0 %574 }
 0x302   : > { %v577_v57 = vmul.f32 %v575_v55, %v572_v54 }
 0x304   : > { %v2644_v59 = vadd.f32 %v581_v56, %v577_v57 }
 0x305   : > { %v700_v61 = vpop.permute.xlu0 %699 }
 0x306   : > { %v702_v63 = vmul.f32 %v700_v61, %v697_v60  ;;  %584 = vrot.lane.b32.xlu0 %v2644_v59, %s2208_s9 }
 0x308   : > { %v2648_v0 = vadd.f32 %v706_v62, %v702_v63 }
 0x30a   : > { %709 = vrot.lane.b32.xlu1 %v2648_v0, %s2208_s9 }
 0x378   : > { %v585_v1 = vpop.permute.xlu0 %584 }
 0x379   : > { %587 = vst.msk [vmem:[%s2568_s18] sm:$0xff] %vm471_vm2, %v585_v1  ;;  %1679 = vmatmul.mubr.msk.f32.vlgmr.msra.gmra.mrb[2].mxu0 %vm471_vm2, %v585_v1 }
 0x37a   : > { %1762 = vmatpush3.bf16.msra.mxu0 %v2575_v5  ;;  %1700 = vmatprep.mubr.msk.f32.mxu0 %vm2204_vm1, %v2205_v10 }
 0x37b   : > { %1763 = vmatprep.subr.bf16.mxu0 %v2203_v4 }
 0x37c   : > { %v710_v2 = vpop.permute.xlu1 %709 }
 0x37d   : > { %1573 = vst.msk [vmem:[%s2570_s2 + $0x18] sm:$0xff] %vm471_vm2, %v710_v2  ;;  %1690 = vmatmul.mubr.msk.f32.vlgmr.msra.gmra.mrb[2].mxu1 %vm471_vm2, %v710_v2 }
 0x37e   : > { %1765 = vmatpush3.bf16.msra.mxu0 %v2585_v13  ;;  %1768 = vmatpush3.bf16.msra.mxu1 %v2578_v9 }
 0x37f   : > { %1769 = vmatprep.subr.bf16.mxu1 %v2203_v4  ;;  %1711 = vmatprep.mubr.msk.f32.mxu1 %vm2204_vm1, %v2205_v10 }
 0x380   : > { %1772 = vmatprep.subr.bf16.mxu0 %v2203_v4 }
 0x382   : > { %1771 = vmatpush3.bf16.msra.mxu1 %v2592_v15 }
 0x383   : > { %1778 = vmatprep.subr.bf16.mxu1 %v2203_v4 }
 0x44c   : > { %v785_v3 = vpop.f32.mrb[2].mxu0 }
 0x44d   : > { %v796_v6 = vadd.f32 %v785_v3, %v2618_v19  ;;  %v1680_v7 = vpop.f32.mrb[3].mxu0  ;;  %v789_v18 = vadd.f32 %v785_v3, %v716_v16 }
 0x44f   : > { %798 = vrot.lane.b32.xlu0 %v796_v6, %s2206_s27  ;;  %v1576_v22 = vmul.f32 -1.442695, %v789_v18 }
 0x450   : > { %v893_v8 = vpop.f32.mrb[2].mxu1 }
 0x451   : > { %v904_v11 = vadd.f32 %v893_v8, %v2620_v21  ;;  %v1691_v12 = vpop.f32.mrb[3].mxu1  ;;  %v897_v23 = vadd.f32 %v893_v8, %v824_v20  ;;  %1908 = vpow2.f32 %v1576_v22 }
 0x453   : > { %906 = vrot.lane.b32.xlu1 %v904_v11, %s2206_s27  ;;  %v1580_v24 = vmul.f32 -1.442695, %v897_v23 }
 0x455   : > { %1910 = vpow2.f32 %v1580_v24 }
 0x45b   : > { %v1909_v25 = vpop.eup %1908 }
 0x45c   : > { %v793_v26 = vadd.f32 1.0, %v1909_v25 }
 0x45e   : > { %1912 = vrcp.f32 %v793_v26 }
 0x45f   : > { %v1911_v28 = vpop.eup %1910 }
 0x460   : > { %v901_v29 = vadd.f32 1.0, %v1911_v28 }
 0x462   : > { %1914 = vrcp.f32 %v901_v29 }
 0x468   : > { %v1913_v31 = vpop.eup %1912 }
 0x469   : > { %v808_v43 = vsub.f32 1.0, %v1913_v31  ;;  %v814_v45 = vmul.f32 %v1913_v31, %v2644_v59 }
 0x46c   : > { %v1915_v34 = vpop.eup %1914 }
 0x46d   : > { %v916_v48 = vsub.f32 1.0, %v1915_v34  ;;  %v922_v50 = vmul.f32 %v1915_v34, %v2648_v0 }
 0x4c1   : > { %v799_v32 = vpop.permute.xlu0 %798 }
 0x4c2   : > { %v801_v33 = vmul.f32 %v1913_v31, %v799_v32 }
 0x4c4   : > { %803 = vrot.lane.b32.xlu0 %v801_v33, %s2206_s27 }
 0x4c5   : > { %v907_v35 = vpop.permute.xlu1 %906 }
 0x4c6   : > { %v909_v36 = vmul.f32 %v1915_v34, %v907_v35 }
 0x4c8   : > { %911 = vrot.lane.b32.xlu1 %v909_v36, %s2206_s27 }
 0x536   : > { %v804_v37 = vpop.permute.xlu0 %803 }
 0x537   : > { %v806_v38 = vadd.f32 %v804_v37, %v716_v16 }
 0x539   : > { %1916 = vtanh.f32 %v806_v38 }
 0x53a   : > { %v912_v39 = vpop.permute.xlu1 %911 }
 0x53b   : > { %v914_v40 = vadd.f32 %v912_v39, %v824_v20 }
 0x53d   : > { %1918 = vtanh.f32 %v914_v40 }
 0x543   : > { %v1917_v41 = vpop.eup %1916 }
 0x544   : > { %810 = vrot.lane.b32.xlu0 %v1917_v41, %s2208_s9 }
 0x547   : > { %v1919_v42 = vpop.eup %1918 }
 0x548   : > { %918 = vrot.lane.b32.xlu1 %v1919_v42, %s2208_s9 }
 0x5b6   : > { %v811_v44 = vpop.permute.xlu0 %810 }
 0x5b7   : > { %v813_v46 = vmul.f32 %v811_v44, %v808_v43  ;;  %v1590_v43 = vld [vmem:[%s2544_s26 + $0x18] sm:$0xff] }
 0x5b8   : > { %v1148_v44 = vadd.f32 %v1590_v43, %v2629_v27 }
 0x5b9   : > { %v2683_v47 = vadd.f32 %v814_v45, %v813_v46  ;;  %v1254_v45 = vld [vmem:[%s2554_s20] sm:$0xff] }
 0x5ba   : > { %v919_v49 = vpop.permute.xlu1 %918 }
 0x5bb   : > { %v921_v51 = vmul.f32 %v919_v49, %v916_v48  ;;  %817 = vrot.lane.b32.xlu0 %v2683_v47, %s2208_s9 }
 0x5bd   : > { %v2688_v52 = vadd.f32 %v922_v50, %v921_v51 }
 0x5bf   : > { %925 = vrot.lane.b32.xlu1 %v2688_v52, %s2208_s9 }
 0x62d   : > { %v818_v53 = vpop.permute.xlu0 %817 }
 0x62e   : > { %1577 = vst.msk [vmem:[%s2568_s18 + $0x8] sm:$0xff] %vm471_vm2, %v818_v53  ;;  %1701 = vmatmul.mubr.msk.f32.vlgmr.msra.gmra.mrb[4].mxu0 %vm471_vm2, %v818_v53 }
 0x62f   : > { %1774 = vmatpush3.bf16.msra.mxu0 %v2575_v5  ;;  %1722 = vmatprep.mubr.msk.f32.mxu0 %vm2204_vm1, %v2205_v10 }
 0x630   : > { %1775 = vmatprep.subr.bf16.mxu0 %v2203_v4 }
 0x631   : > { %v926_v54 = vpop.permute.xlu1 %925 }
 0x632   : > { %1581 = vst.msk [vmem:[%s2570_s2 + $0x10] sm:$0xff] %vm471_vm2, %v926_v54  ;;  %1712 = vmatmul.mubr.msk.f32.vlgmr.msra.gmra.mrb[4].mxu1 %vm471_vm2, %v926_v54 }
 0x633   : > { %1777 = vmatpush3.bf16.msra.mxu0 %v2585_v13  ;;  %1780 = vmatpush3.bf16.msra.mxu1 %v2578_v9  ;;  %v1582_v9 = vld [vmem:[%s2544_s26 + $0x10] sm:$0xff]  ;;  %v1586_v13 = vld [vmem:[%s2554_s20 + $0x8] sm:$0xff]  ;;  %s1606_s26 = sshll.u32 %s2299_s16, 9  ;;  %s1381_s20 = sshll.u32 %s2568_s18, 4  ;;  %s2752_s20 = int_to_ptr.vmem [resolvable:$true] %s1381_s20 }
 0x634   : > { %1781 = vmatprep.subr.bf16.mxu1 %v2203_v4  ;;  %1733 = vmatprep.mubr.msk.f32.mxu1 %vm2204_vm1, %v2205_v10  ;;  %v932_v4 = vadd.f32 %v1582_v9, %v2629_v27  ;;  %v1040_v10 = vadd.f32 %v1586_v13, %v2636_v30  ;;  %s2750_s22 = scalar_lea.hbm %s2924_s0, %s1606_s26 }
 0x637   : > { %1783 = vmatpush3.bf16.msra.mxu1 %v2592_v15 }
 0x701   : > { %v1001_v5 = vpop.f32.mrb[4].mxu0 }
 0x702   : > { %v1012_v55 = vadd.f32 %v1001_v5, %v2618_v19  ;;  %v1702_v56 = vpop.f32.mrb[5].mxu0  ;;  %v1005_v60 = vadd.f32 %v1001_v5, %v932_v4 }
 0x704   : > { %1014 = vrot.lane.b32.xlu0 %v1012_v55, %s2206_s27  ;;  %v1584_v15 = vmul.f32 -1.442695, %v1005_v60 }
 0x705   : > { %v1109_v57 = vpop.f32.mrb[4].mxu1 }
 0x706   : > { %v1120_v58 = vadd.f32 %v1109_v57, %v2620_v21  ;;  %v1713_v59 = vpop.f32.mrb[5].mxu1  ;;  %v1113_v61 = vadd.f32 %v1109_v57, %v1040_v10  ;;  %1920 = vpow2.f32 %v1584_v15 }
 0x708   : > { %1122 = vrot.lane.b32.xlu1 %v1120_v58, %s2206_s27  ;;  %v1588_v62 = vmul.f32 -1.442695, %v1113_v61 }
 0x70a   : > { %1922 = vpow2.f32 %v1588_v62 }
 0x710   : > { %v1921_v63 = vpop.eup %1920 }
 0x711   : > { %v1009_v0 = vadd.f32 1.0, %v1921_v63 }
 0x713   : > { %1924 = vrcp.f32 %v1009_v0 }
 0x714   : > { %v1923_v1 = vpop.eup %1922 }
 0x715   : > { %v1117_v2 = vadd.f32 1.0, %v1923_v1 }
 0x717   : > { %1926 = vrcp.f32 %v1117_v2 }
 0x71d   : > { %v1925_v3 = vpop.eup %1924 }
 0x71e   : > { %v1024_v23 = vsub.f32 1.0, %v1925_v3  ;;  %v1030_v25 = vmul.f32 %v1925_v3, %v2683_v47  ;;  %v1255_v47 = vadd.f32 %v2636_v30, %v1254_v45 }
 0x721   : > { %v1927_v8 = vpop.eup %1926 }
 0x722   : > { %v1132_v29 = vsub.f32 1.0, %v1927_v8  ;;  %v1138_v32 = vmul.f32 %v1927_v8, %v2688_v52 }
 0x776   : > { %v1015_v6 = vpop.permute.xlu0 %1014 }
 0x777   : > { %v1017_v7 = vmul.f32 %v1925_v3, %v1015_v6 }
 0x779   : > { %1019 = vrot.lane.b32.xlu0 %v1017_v7, %s2206_s27 }
 0x77a   : > { %v1123_v11 = vpop.permute.xlu1 %1122 }
 0x77b   : > { %v1125_v12 = vmul.f32 %v1927_v8, %v1123_v11 }
 0x77d   : > { %1127 = vrot.lane.b32.xlu1 %v1125_v12, %s2206_s27 }
 0x7eb   : > { %v1020_v14 = vpop.permute.xlu0 %1019 }
 0x7ec   : > { %v1022_v16 = vadd.f32 %v1020_v14, %v932_v4 }
 0x7ee   : > { %1928 = vtanh.f32 %v1022_v16 }
 0x7ef   : > { %v1128_v17 = vpop.permute.xlu1 %1127 }
 0x7f0   : > { %v1130_v18 = vadd.f32 %v1128_v17, %v1040_v10 }
 0x7f2   : > { %1930 = vtanh.f32 %v1130_v18 }
 0x7f8   : > { %v1929_v20 = vpop.eup %1928 }
 0x7f9   : > { %1026 = vrot.lane.b32.xlu0 %v1929_v20, %s2208_s9 }
 0x7fc   : > { %v1931_v22 = vpop.eup %1930 }
 0x7fd   : > { %1134 = vrot.lane.b32.xlu1 %v1931_v22, %s2208_s9 }
 0x86b   : > { %v1027_v24 = vpop.permute.xlu0 %1026 }
 0x86c   : > { %v1029_v26 = vmul.f32 %v1027_v24, %v1024_v23 }
 0x86e   : > { %v1031_v28 = vadd.f32 %v1030_v25, %v1029_v26 }
 0x86f   : > { %v1135_v31 = vpop.permute.xlu1 %1134 }
 0x870   : > { %v1137_v33 = vmul.f32 %v1135_v31, %v1132_v29  ;;  %1033 = vrot.lane.b32.xlu0 %v1031_v28, %s2208_s9 }
 0x872   : > { %v1139_v34 = vadd.f32 %v1138_v32, %v1137_v33 }
 0x874   : > { %1141 = vrot.lane.b32.xlu1 %v1139_v34, %s2208_s9 }
 0x8e2   : > { %v1034_v35 = vpop.permute.xlu0 %1033 }
 0x8e3   : > { %1585 = vst.msk [vmem:[%s2568_s18 + $0x10] sm:$0xff] %vm471_vm2, %v1034_v35  ;;  %1723 = vmatmul.mubr.msk.f32.vlgmr.msra.gmra.mrb[6].mxu0 %vm471_vm2, %v1034_v35 }
 0x8e6   : > { %v1142_v36 = vpop.permute.xlu1 %1141 }
 0x8e7   : > { %1589 = vst.msk [vmem:[%s2570_s2 + $0x8] sm:$0xff] %vm471_vm2, %v1142_v36  ;;  %1734 = vmatmul.mubr.msk.f32.vlgmr.msra.gmra.mrb[6].mxu1 %vm471_vm2, %v1142_v36 }
 0x9b6   : > { %v1217_v37 = vpop.f32.mrb[6].mxu0 }
 0x9b7   : > { %v1228_v38 = vadd.f32 %v1217_v37, %v2618_v19  ;;  %v1724_v39 = vpop.f32.mrb[7].mxu0  ;;  %v1221_v46 = vadd.f32 %v1217_v37, %v1148_v44 }
 0x9b9   : > { %1230 = vrot.lane.b32.xlu0 %v1228_v38, %s2206_s27  ;;  %v1592_v48 = vmul.f32 -1.442695, %v1221_v46 }
 0x9ba   : > { %v1324_v40 = vpop.f32.mrb[6].mxu1 }
 0x9bb   : > { %v1335_v41 = vadd.f32 %v1324_v40, %v2620_v21  ;;  %v1735_v42 = vpop.f32.mrb[7].mxu1  ;;  %v1328_v49 = vadd.f32 %v1324_v40, %v1255_v47  ;;  %1932 = vpow2.f32 %v1592_v48 }
 0x9bd   : > { %1337 = vrot.lane.b32.xlu1 %v1335_v41, %s2206_s27  ;;  %v1595_v19 = vmul.f32 -1.442695, %v1328_v49 }
 0x9bf   : > { %1934 = vpow2.f32 %v1595_v19 }
 0x9c5   : > { %v1933_v50 = vpop.eup %1932 }
 0x9c6   : > { %v1225_v51 = vadd.f32 1.0, %v1933_v50 }
 0x9c8   : > { %1936 = vrcp.f32 %v1225_v51 }
 0x9c9   : > { %v1935_v52 = vpop.eup %1934 }
 0x9ca   : > { %v1332_v21 = vadd.f32 1.0, %v1935_v52 }
 0x9cc   : > { %1938 = vrcp.f32 %v1332_v21 }
 0x9d2   : > { %v1937_v53 = vpop.eup %1936 }
 0x9d3   : > { %v1240_v13 = vsub.f32 1.0, %v1937_v53  ;;  %v1246_v10 = vmul.f32 %v1937_v53, %v1031_v28 }
 0x9d6   : > { %v1939_v27 = vpop.eup %1938 }
 0x9d7   : > { %v1347_v62 = vsub.f32 1.0, %v1939_v27  ;;  %v1353_v0 = vmul.f32 %v1939_v27, %v1139_v34 }
 0xa2b   : > { %v1231_v54 = vpop.permute.xlu0 %1230 }
 0xa2c   : > { %v1233_v5 = vmul.f32 %v1937_v53, %v1231_v54 }
 0xa2e   : > { %1235 = vrot.lane.b32.xlu0 %v1233_v5, %s2206_s27 }
 0xa2f   : > { %v1338_v55 = vpop.permute.xlu1 %1337 }
 0xa30   : > { %v1340_v56 = vmul.f32 %v1939_v27, %v1338_v55 }
 0xa32   : > { %1342 = vrot.lane.b32.xlu1 %v1340_v56, %s2206_s27  ;;  %s1391_s27 = ssub.s32 1, %s2299_s16  ;;  %s2060_s16 = scalar_lea.vmem %s2752_s20, 512 }
 0xa33   : > { %s2754_s21 = sshll.u32 %s1391_s27, 9  ;;  %p2061_p1 = scmp.ne.s32.totalorder %s2752_s20, %s2060_s16 }
 0xa35   : > { %p2062_p7 = pnand %p2061_p1, %p2925_p0 }
 0xa37   : > { %p2063_p5 = pneg %p2062_p7 }
 0xaa0   : > { %v1236_v30 = vpop.permute.xlu0 %1235 }
 0xaa1   : > { %v1238_v57 = vadd.f32 %v1236_v30, %v1148_v44 }
 0xaa3   : > { %1940 = vtanh.f32 %v1238_v57 }
 0xaa4   : > { %v1343_v58 = vpop.permute.xlu1 %1342 }
 0xaa5   : > { %v1345_v59 = vadd.f32 %v1343_v58, %v1255_v47 }
 0xaa7   : > { %1942 = vtanh.f32 %v1345_v59 }
 0xaad   : > { %v1941_v9 = vpop.eup %1940 }
 0xaae   : > { %1242 = vrot.lane.b32.xlu0 %v1941_v9, %s2208_s9 }
 0xab1   : > { %v1943_v4 = vpop.eup %1942 }
 0xab2   : > { %1349 = vrot.lane.b32.xlu1 %v1943_v4, %s2208_s9 }
 0xb20   : > { %v1243_v60 = vpop.permute.xlu0 %1242 }
 0xb21   : > { %v1245_v15 = vmul.f32 %v1243_v60, %v1240_v13 }
 0xb23   : > { %v1247_v61 = vadd.f32 %v1246_v10, %v1245_v15 }
 0xb24   : > { %v1350_v63 = vpop.permute.xlu1 %1349 }
 0xb25   : > { %v1352_v1 = vmul.f32 %v1350_v63, %v1347_v62  ;;  %1249 = vrot.lane.b32.xlu0 %v1247_v61, %s2208_s9 }
 0xb27   : > { %v1354_v2 = vadd.f32 %v1353_v0, %v1352_v1 }
 0xb29   : > { %1356 = vrot.lane.b32.xlu1 %v1354_v2, %s2208_s9  ;;  %s2209_s9 = smov [#allocation12]  }
 0xb2a   : > { %s2064_s26 = sshll.u32 %s2209_s9, 4  ;;  %s2065_s26 = int_to_ptr.vmem [resolvable:$false] %s2064_s26 }
 0xb2b   : > { %s2066_s17 = scalar_lea.vmem %s2065_s26, 1024  ;;  %p2067_p4 = scmp.lt.s32.totalorder %s2752_s20, %s2065_s26 }
 0xb2c   : > { %p2068_p8 = scmp.lt.s32.totalorder %s2066_s17, %s2060_s16 }
 0xb2e   : > { %p2069_p9 = por %p2068_p8, %p2067_p4 }
 0xb30   : > { %p2070_p3 = pnand %p2069_p9, %p2063_p5 }
 0xb97   : > { %v1250_v3 = vpop.permute.xlu0 %1249 }
 0xb98   : > { %1593 = vst.msk [vmem:[%s2568_s18 + $0x18] sm:$0xff] %vm471_vm2, %v1250_v3  ;;  %1360 = vst.msk [vmem:[#allocation2] sm:$0xff] %vm471_vm2, %v1250_v3 }
 0xb99   : > { %2073 = shalt.err (!%p2070_p3)
}
 0xb9a   : > { %s2074_s18 = scalar_lea.hbm %s2750_s22, 512  ;;  %s2078_s9 = scalar_lea.hbm %s2924_s0, 1024 }
 0xb9b   : > { %p2075_p12 = scmp.ne.s32.totalorder %s2750_s22, %s2074_s18  ;;  %p2079_p11 = scmp.lt.u32.totalorder %s2750_s22, %s2924_s0 }
 0xb9c   : > { %p2080_p10 = scmp.lt.u32.totalorder %s2078_s9, %s2074_s18  ;;  %p2082_p1 = scmp.lt.u32.totalorder %s2074_s18, %s2750_s22 }
 0xb9d   : > { %p2076_p13 = pnand %p2075_p12, %p2925_p0 }
 0xb9e   : > { %p2081_p2 = por %p2080_p10, %p2079_p11 }
 0xb9f   : > { %p2077_p6 = pneg %p2076_p13 }
 0xba0   : > { %p2083_p7 = por %p2082_p1, %p2081_p2 }
 0xba2   : > { %p2084_p5 = pnand %p2083_p7, %p2077_p6 }
 0xba4   : > { %2087 = shalt.err (!%p2084_p5)
}
 0xba5   : > { %s2210_s16 = smov 128   ;;  %s2211_s17 = smov 8   ;;  %v1357_v6 = vpop.permute.xlu1 %1356 }
 0xba6   : > { %1796 = dma.vmem_to_hbm [thread:$0]  (%p2925_p0), %s2752_s20, 512, %s2750_s22, %s1363_s19, %s2210_s16, %s2210_s16, %s2211_s17   ;;  %1361 = vst.msk [vmem:[#allocation3] sm:$0xff] %vm471_vm2, %v1357_v6 }
 0xba7   : > { %s2926_s27 = sld [smem:[#allocation29_spill]]  ;;  %1359 = vst.msk [vmem:[%s2570_s2] sm:$0xff] %vm471_vm2, %v1357_v6  ;;  %s2927_s28 = sand.u32 1, %s2174_s10  }
 0xba8   : > { %s2802_s9 = scalar_lea.sflag [#allocation14], %s2927_s28  ;;  %s2088_s24 = scalar_lea.vmem %s2795_s29, 512 }
 0xba9   : > { %p2089_p0 = scmp.ne.s32.totalorder %s2795_s29, %s2088_s24  ;;  %p2928_p4 = scmp.ne.s32.totalorder %s2913_s23, 0 }
 0xbaa   : > { %s2212_s20 = smov [#allocation13]  }
 0xbab   : > { %p2090_p8 = pnand %p2089_p0, %p2928_p4  ;;  %s2092_s22 = sshll.u32 %s2212_s20, 4  ;;  %s2093_s22 = int_to_ptr.vmem [resolvable:$false] %s2092_s22 }
 0xbac   : > { %p2095_p3 = scmp.lt.s32.totalorder %s2795_s29, %s2093_s22 }
 0xbad   : > { %s2791_s25 = scalar_lea.hbm %s2926_s27, %s2754_s21  ;;  %p2091_p9 = pneg %p2090_p8 }
 0xbae   : > { %s2094_s21 = scalar_lea.vmem %s2093_s22, 1024 }
 0xbaf   : > { %p2096_p12 = scmp.lt.s32.totalorder %s2094_s21, %s2088_s24 }
 0xbb1   : > { %p2097_p13 = por %p2096_p12, %p2095_p3 }
 0xbb3   : > { %p2098_p6 = pnand %p2097_p13, %p2091_p9 }
 0xbb5   : > { %2101 = shalt.err (!%p2098_p6)
}
 0xbb6   : > { %s2102_s2 = scalar_lea.hbm %s2791_s25, 512  ;;  %s2106_s12 = scalar_lea.hbm %s2926_s27, 1024 }
 0xbb7   : > { %p2103_p11 = scmp.ne.s32.totalorder %s2791_s25, %s2102_s2  ;;  %p2107_p1 = scmp.lt.u32.totalorder %s2791_s25, %s2926_s27 }
 0xbb8   : > { %p2108_p7 = scmp.lt.u32.totalorder %s2106_s12, %s2102_s2  ;;  %p2110_p0 = scmp.lt.u32.totalorder %s2102_s2, %s2791_s25 }
 0xbb9   : > { %p2104_p10 = pnand %p2103_p11, %p2928_p4 }
 0xbba   : > { %p2109_p5 = por %p2108_p7, %p2107_p1 }
 0xbbb   : > { %p2105_p2 = pneg %p2104_p10 }
 0xbbc   : > { %p2111_p8 = por %p2110_p0, %p2109_p5 }
 0xbbe   : > { %p2112_p9 = pnand %p2111_p8, %p2105_p2 }
 0xbc0   : > { %2115 = shalt.err (!%p2112_p9)
}
 0xbc1   : > { %1797 = dma.vmem_to_hbm [thread:$0]  (%p2928_p4), %s2795_s29, 512, %s2791_s25, %s2802_s9, %s2210_s16, %s2210_s16, %s2211_s17  }
 0xbc2 PF: > { %s2929_s24 = sld [smem:[#allocation22_spill]]  ;;  %s2930_s20 = sld [smem:[#allocation23_spill]] }
 0xbc3   : > { %p2932_p12 = scmp.ge.s32.totalorder %s2194_s15, 2 }
 0xbc8   : > { %s1413_s22 = sand.u32 1, %s2929_s24   ;;  %p2931_p3 = scmp.ne.s32.totalorder %s2930_s20, 0 }
 0xbc9   : > { %s1414_s21 = scalar_lea.sflag [#allocation6], %s1413_s22 }
 0xbca   : > { %p1815_p13 = pnand %p2932_p12, %p2931_p3 }
 0xbcc   : > { %2161 = dma.done.wait (!%p1815_p13), %s1414_s21, 512  }
 0xbcd   : > { %2163 = vsyncadd (!%p1815_p13), %s1414_s21, 4294966784  ;;  %s2933_s2 = sld [smem:[#allocation21_spill]]  ;;  %s2934_s23 = sld [smem:[#allocation24_spill]] }
 0xbce   : > { %p2936_p11 = pmov %p2932_p12 }
 0xbd3   : > { %s1422_s19 = sand.u32 1, %s2933_s2   ;;  %p2935_p6 = scmp.ne.s32.totalorder %s2934_s23, 0 }
 0xbd4   : > { %s1423_s26 = scalar_lea.sflag [#allocation14], %s1422_s19 }
 0xbd5   : > { %p1818_p10 = pnand %p2936_p11, %p2935_p6 }
 0xbd7   : > { %2165 = dma.done.wait (!%p1818_p10), %s1423_s26, 512  }
 0xbd8   : > { %2167 = vsyncadd (!%p1818_p10), %s1423_s26, 4294966784  ;;  %s2937_s29 = smov %s2476_s30  ;;  %p30_p4 = scmp.ge.s32.totalorder %s2435_s8, 4  }
 0xbd9   : > { %s2938_s30 = smov %s2174_s10  ;;  %s2939_s10 = smov %s2178_s11 }
 0xbda   : > { %s2940_s11 = smov %s2483_s3  ;;  %s2941_s12 = smov %s2186_s13 }
 0xbdb   : > { %s2942_s13 = smov %s2190_s14  ;;  %s2943_s14 = smov %s2937_s29 }
 0xbdc   : > { %s2944_s15 = smov %s2435_s8  ;;  %32 = sbr.rel (!%p30_p4) target bundleno = 18 (0x12), region = 151 }
 0xbe3   :  { %1428 = vsyncpa [#allocation5], 1 }
 0xbe4   :  { %1430 = vsyncpa [#allocation5 + $0x1], 1 }
 0xbe5   :  { %1431 = vsyncpa [#allocation8], 1 }
 0xbe6   :  { %1433 = vsyncpa [#allocation8 + $0x1], 1 }
 0xbe7   :  { %1434 = vsyncpa [#allocation11], 1 }
 0xbe8   :  { %1435 = vsyncpa [#allocation6], 1 }
 0xbe9   :  { %1437 = vsyncpa [#allocation6 + $0x1], 1 }
 0xbea   :  { %1438 = vsyncpa [#allocation14], 1 }
 0xbeb   :  { %1440 = vsyncpa [#allocation14 + $0x1], 1 }

</bundles_post_ra>
